<compile_context>
chip_gen: v7x
topology: tpu7x:2x2x1
jax: 0.10.0
libtpu: 0.0.40
codegen_flags: <defaults>
</compile_context>

<pallas_src>
import jax
import jax.numpy as jnp
from jax import lax
from jax.experimental import pallas as pl
from jax.experimental.pallas import tpu as pltpu


def _round_up(x, m):
    return (x + m - 1) // m * m


def lstm_last_hidden_fc_kernel(x_ref, len_ref, wih_ref, whh_ref, b_ref,
                               wfc_ref, bfc_ref, out_ref, gx_ref):
    # x_ref:   [T*Bp, E]     bf16 time-major embedded tokens (Bp = padded batch)
    # len_ref: [Bp, 1]       int32 sequence lengths
    # wih_ref: [E, 4*Hp]     bf16, gate-blocked (i|f|g|o), each block Hp lanes
    # whh_ref: [Hp, 4*Hp]    bf16, gate-blocked
    # b_ref:   [1, 4*Hp]     f32 (b_ih + b_hh), gate-blocked
    # wfc_ref: [Hp, Op]      bf16
    # bfc_ref: [1, Op]       f32
    # out_ref: [Bp, Op]      f32
    # gx_ref:  [T*Bp, 4*Hp]  f32 scratch: hoisted x @ W_ih + b for all timesteps
    TB, _ = x_ref.shape
    Bp = len_ref.shape[0]
    T = TB // Bp
    Hp = whh_ref.shape[0]

    # Hoisted input projection (+ bias) for all timesteps: one big MXU matmul.
    gx_ref[...] = (jnp.dot(x_ref[...], wih_ref[...],
                           preferred_element_type=jnp.float32) + b_ref[...])

    # Hoisted mask broadcast (avoid per-step broadcast of a lane-width-1 value).
    len_b = jnp.broadcast_to(len_ref[...], (Bp, Hp))          # [Bp, Hp] int32

    def step(t, carry):
        h, c = carry                                          # f32 [Bp, Hp]
        gx_t = gx_ref[pl.ds(t * Bp, Bp), :]                   # [Bp, 4*Hp]
        gates = gx_t + jnp.dot(h.astype(whh_ref.dtype), whh_ref[...],
                               preferred_element_type=jnp.float32)
        # Each gate slice is a whole lane-aligned 128-wide block (Hp = 128*k).
        i_g = jax.nn.sigmoid(gates[:, 0 * Hp:1 * Hp])
        f_g = jax.nn.sigmoid(gates[:, 1 * Hp:2 * Hp])
        g_g = jnp.tanh(gates[:, 2 * Hp:3 * Hp])
        o_g = jax.nn.sigmoid(gates[:, 3 * Hp:4 * Hp])
        c_new = f_g * c + i_g * g_g
        h_new = o_g * jnp.tanh(c_new)
        # Packed-sequence semantics: freeze state once past the sequence length.
        m = t < len_b                                         # [Bp, Hp] bool
        h = jnp.where(m, h_new, h)
        c = jnp.where(m, c_new, c)
        return (h, c)

    h0 = jnp.zeros((Bp, Hp), jnp.float32)
    c0 = jnp.zeros((Bp, Hp), jnp.float32)
    h, _ = lax.fori_loop(0, T, step, (h0, c0), unroll=True)

    out_ref[...] = (jnp.dot(h.astype(wfc_ref.dtype), wfc_ref[...],
                            preferred_element_type=jnp.float32) + bfc_ref[...])


def _pack_gate_weight(w, H, Hp):
    """PyTorch gate-stacked [4H, in_dim] -> gate-blocked, zero-padded [in_dim, 4*Hp]."""
    in_dim = w.shape[1]
    w4 = w.reshape(4, H, in_dim)                      # gate order (i, f, g, o)
    w4 = jnp.pad(w4, ((0, 0), (0, Hp - H), (0, 0)))
    return jnp.transpose(w4, (2, 0, 1)).reshape(in_dim, 4 * Hp)


def simple_rnn_forward(text, lengths, params):
    """text: [B, T] int32 token ids; lengths: [B] int32. Returns [B, output_dim]."""
    emb_table = params["embedding"]          # [V, E]
    w_ih = params["w_ih"]                    # [4H, E]  (PyTorch layout)
    w_hh = params["w_hh"]                    # [4H, H]
    b_all = params["b_ih"] + params["b_hh"]  # [4H]
    w_fc = params["w_fc"]                    # [O, H]
    b_fc = params["b_fc"]                    # [O]

    B, T = text.shape
    E = emb_table.shape[1]
    H = w_hh.shape[1]
    O = w_fc.shape[0]

    LANE, SUBLANE = 128, 8
    Hp = _round_up(H, LANE)
    Op = _round_up(O, LANE)
    Bp = _round_up(B, SUBLANE)
    G = 4 * Hp

    # Embedding gather directly in time-major order; pad batch; bf16 for the MXU.
    x_tbe = jnp.take(emb_table, text.T, axis=0)                     # [T, B, E]
    x_tbe = jnp.pad(x_tbe, ((0, 0), (0, Bp - B), (0, 0)))
    x2d = x_tbe.reshape(T * Bp, E).astype(jnp.bfloat16)             # [T*Bp, E]

    # Padded rows get length 0 -> their state stays frozen at zero.
    len_col = jnp.pad(lengths.astype(jnp.int32), (0, Bp - B)).reshape(Bp, 1)

    wih_p = _pack_gate_weight(w_ih, H, Hp).astype(jnp.bfloat16)             # [E, G]
    whh_p = _pack_gate_weight(w_hh, H, Hp)                                  # [H, G]
    whh_p = jnp.pad(whh_p, ((0, Hp - H), (0, 0))).astype(jnp.bfloat16)      # [Hp, G]
    b_p = jnp.pad(b_all.reshape(4, H), ((0, 0), (0, Hp - H)))
    b_p = b_p.reshape(1, G).astype(jnp.float32)                             # [1, G]
    wfc_p = jnp.pad(w_fc.T, ((0, Hp - H), (0, Op - O))).astype(jnp.bfloat16)  # [Hp, Op]
    bfc_p = jnp.pad(b_fc, (0, Op - O)).reshape(1, Op).astype(jnp.float32)     # [1, Op]

    vmem = pl.BlockSpec(memory_space=pltpu.MemorySpace.VMEM)
    out_pad = pl.pallas_call(
        lstm_last_hidden_fc_kernel,
        out_shape=jax.ShapeDtypeStruct((Bp, Op), jnp.float32),
        in_specs=[vmem] * 7,
        out_specs=vmem,
        scratch_shapes=[pltpu.VMEM((T * Bp, G), jnp.float32)],
        compiler_params=pltpu.CompilerParams(vmem_limit_bytes=32 * 1024 * 1024),
    )(x2d, len_col, wih_p, whh_p, b_p, wfc_p, bfc_p)
    # TODO(synk): for large T/B, stream x over a time grid axis (double-buffered)
    # instead of a resident [T*B, E] slab (matters on v7x's 64 MiB VMEM), and add a
    # 'parallel' batch grid axis so both v7x TensorCores run the recurrence.
    return out_pad[:B, :O]


def reference_forward(text, lengths, params):
    """Pure-JAX reference mirroring PyTorch Embedding -> packed LSTM -> fc,
    with the same bf16-at-MXU / f32-accumulation numerics as the kernel."""
    emb = jnp.take(params["embedding"], text, axis=0)               # [B, T, E]
    B, T, _ = emb.shape
    H = params["w_hh"].shape[1]
    w_ih = params["w_ih"].astype(jnp.bfloat16)
    w_hh = params["w_hh"].astype(jnp.bfloat16)
    b = (params["b_ih"] + params["b_hh"]).astype(jnp.float32)
    h = jnp.zeros((B, H), jnp.float32)
    c = jnp.zeros((B, H), jnp.float32)
    for t in range(T):
        x_t = emb[:, t, :].astype(jnp.bfloat16)
        gates = (jnp.dot(x_t, w_ih.T, preferred_element_type=jnp.float32)
                 + jnp.dot(h.astype(jnp.bfloat16), w_hh.T,
                           preferred_element_type=jnp.float32) + b)
        i_g = jax.nn.sigmoid(gates[:, 0 * H:1 * H])
        f_g = jax.nn.sigmoid(gates[:, 1 * H:2 * H])
        g_g = jnp.tanh(gates[:, 2 * H:3 * H])
        o_g = jax.nn.sigmoid(gates[:, 3 * H:4 * H])
        c_new = f_g * c + i_g * g_g
        h_new = o_g * jnp.tanh(c_new)
        m = (t < lengths)[:, None]
        h = jnp.where(m, h_new, h)
        c = jnp.where(m, c_new, c)
    return (jnp.dot(h.astype(jnp.bfloat16),
                    params["w_fc"].astype(jnp.bfloat16).T,
                    preferred_element_type=jnp.float32)
            + params["b_fc"].astype(jnp.float32))


def init_params(key, vocab_size, embedding_dim, hidden_dim, output_dim):
    ks = jax.random.split(key, 7)
    s = 1.0 / jnp.sqrt(hidden_dim)
    return {
        "embedding": jax.random.normal(ks[0], (vocab_size, embedding_dim), jnp.float32),
        "w_ih": jax.random.uniform(ks[1], (4 * hidden_dim, embedding_dim), jnp.float32, -s, s),
        "w_hh": jax.random.uniform(ks[2], (4 * hidden_dim, hidden_dim), jnp.float32, -s, s),
        "b_ih": jax.random.uniform(ks[3], (4 * hidden_dim,), jnp.float32, -s, s),
        "b_hh": jax.random.uniform(ks[4], (4 * hidden_dim,), jnp.float32, -s, s),
        "w_fc": jax.random.uniform(ks[5], (output_dim, hidden_dim), jnp.float32, -s, s),
        "b_fc": jax.random.uniform(ks[6], (output_dim,), jnp.float32, -s, s),
    }


if __name__ == "__main__":
    vocab_size, embedding_dim, hidden_dim, output_dim = 50, 32, 32, 4
    B, T = 2, 8

    key = jax.random.PRNGKey(0)
    k_param, k_text = jax.random.split(key)
    params = init_params(k_param, vocab_size, embedding_dim, hidden_dim, output_dim)

    text = jax.random.randint(k_text, (B, T), 0, vocab_size, dtype=jnp.int32)
    lengths = jnp.array([8, 5], dtype=jnp.int32)  # variable-length (padded) sequences

    out = simple_rnn_forward(text, lengths, params)
    out = jax.block_until_ready(out)

    ref = reference_forward(text, lengths, params)
    assert out.shape == (B, output_dim)
    assert jnp.allclose(out, ref, atol=1e-3, rtol=1e-3), (out, ref)

    print("KERNEL_OK")
</pallas_src>

<mosaic_0001>
module attributes {stable_mosaic.version = 11 : i64} {
  func.func @lstm_last_hidden_fc_kernel(%arg0: memref<64x32xbf16, #tpu.memory_space<vmem>>, %arg1: memref<8x1xi32, #tpu.memory_space<vmem>>, %arg2: memref<32x512xbf16, #tpu.memory_space<vmem>>, %arg3: memref<128x512xbf16, #tpu.memory_space<vmem>>, %arg4: memref<1x512xf32, #tpu.memory_space<vmem>>, %arg5: memref<128x128xbf16, #tpu.memory_space<vmem>>, %arg6: memref<1x128xf32, #tpu.memory_space<vmem>>, %arg7: memref<8x128xf32, #tpu.memory_space<vmem>>, %arg8: memref<64x512xf32, #tpu.memory_space<vmem>>) attributes {dimension_semantics = [], scalar_prefetch = 0 : i64, scratch_operands = 1 : i64, tpu.core_type = #tpu.core_type<tc>} {
    %c0 = arith.constant 0 : index
    %c0_0 = arith.constant 0 : index
    %0 = vector.load %arg0[%c0, %c0_0] : memref<64x32xbf16, #tpu.memory_space<vmem>>, vector<64x32xbf16>
    %c0_1 = arith.constant 0 : index
    %c0_2 = arith.constant 0 : index
    %1 = vector.load %arg2[%c0_1, %c0_2] : memref<32x512xbf16, #tpu.memory_space<vmem>>, vector<32x512xbf16>
    %cst = arith.constant dense<0.000000e+00> : vector<64x512xf32>
    %2 = tpu.matmul %0, %1, %cst {dimension_numbers = #tpu.dot_dimension_numbers<[1], [0], [0], [1], [0, 0, 1, 1], [], []>} : vector<64x32xbf16>, vector<32x512xbf16>, vector<64x512xf32> -> vector<64x512xf32>
    %c0_3 = arith.constant 0 : index
    %c0_4 = arith.constant 0 : index
    %3 = vector.load %arg4[%c0_3, %c0_4] : memref<1x512xf32, #tpu.memory_space<vmem>>, vector<1x512xf32>
    %4 = vector.broadcast %3 : vector<1x512xf32> to vector<64x512xf32>
    %5 = arith.addf %2, %4 : vector<64x512xf32>
    %c0_5 = arith.constant 0 : index
    %c0_6 = arith.constant 0 : index
    %6 = vector.load %arg8[%c0_5, %c0_6] : memref<64x512xf32, #tpu.memory_space<vmem>>, vector<64x512xf32>
    tpu.vector_store %arg8[%c0_5, %c0_6], %5 {strides = array<i32>} : memref<64x512xf32, #tpu.memory_space<vmem>>, vector<64x512xf32>,
    %c0_7 = arith.constant 0 : index
    %c0_8 = arith.constant 0 : index
    %7 = vector.load %arg1[%c0_7, %c0_8] : memref<8x1xi32, #tpu.memory_space<vmem>>, vector<8x1xi32>
    %8 = vector.shape_cast %7 : vector<8x1xi32> to vector<8x1xi32>
    %9 = vector.broadcast %8 : vector<8x1xi32> to vector<8x128xi32>
    %cst_9 = arith.constant 0.000000e+00 : f32
    %10 = vector.broadcast %cst_9 : f32 to vector<8x128xf32>
    %cst_10 = arith.constant 0.000000e+00 : f32
    %11 = vector.broadcast %cst_10 : f32 to vector<8x128xf32>
    %c0_i32 = arith.constant 0 : i32
    %c8_i32 = arith.constant 8 : i32
    %12 = arith.muli %c0_i32, %c8_i32 : i32
    %13 = arith.index_cast %12 : i32 to index
    %c0_11 = arith.constant 0 : index
    %14 = vector.load %arg8[%13, %c0_11] : memref<64x512xf32, #tpu.memory_space<vmem>>, vector<8x512xf32>
    %15 = arith.truncf %10 : vector<8x128xf32> to vector<8x128xbf16>
    %c0_12 = arith.constant 0 : index
    %c0_13 = arith.constant 0 : index
    %16 = vector.load %arg3[%c0_12, %c0_13] : memref<128x512xbf16, #tpu.memory_space<vmem>>, vector<128x512xbf16>
    %cst_14 = arith.constant dense<0.000000e+00> : vector<8x512xf32>
    %17 = tpu.matmul %15, %16, %cst_14 {dimension_numbers = #tpu.dot_dimension_numbers<[1], [0], [0], [1], [0, 0, 1, 1], [], []>} : vector<8x128xbf16>, vector<128x512xbf16>, vector<8x512xf32> -> vector<8x512xf32>
    %18 = arith.addf %14, %17 : vector<8x512xf32>
    %19 = vector.extract_strided_slice %18 {offsets = [0, 0], sizes = [8, 128], strides = [1, 1]} : vector<8x512xf32> to vector<8x128xf32>
    %20 = arith.negf %19 : vector<8x128xf32>
    %21 = math.exp %20 : vector<8x128xf32>
    %cst_15 = arith.constant 1.000000e+00 : f32
    %22 = vector.broadcast %cst_15 : f32 to vector<8x128xf32>
    %23 = arith.addf %22, %21 : vector<8x128xf32>
    %24 = arith.divf %22, %23 : vector<8x128xf32>
    %25 = vector.extract_strided_slice %18 {offsets = [0, 128], sizes = [8, 128], strides = [1, 1]} : vector<8x512xf32> to vector<8x128xf32>
    %26 = arith.negf %25 : vector<8x128xf32>
    %27 = math.exp %26 : vector<8x128xf32>
    %cst_16 = arith.constant 1.000000e+00 : f32
    %28 = vector.broadcast %cst_16 : f32 to vector<8x128xf32>
    %29 = arith.addf %28, %27 : vector<8x128xf32>
    %30 = arith.divf %28, %29 : vector<8x128xf32>
    %31 = vector.extract_strided_slice %18 {offsets = [0, 256], sizes = [8, 128], strides = [1, 1]} : vector<8x512xf32> to vector<8x128xf32>
    %32 = math.tanh %31 : vector<8x128xf32>
    %33 = vector.extract_strided_slice %18 {offsets = [0, 384], sizes = [8, 128], strides = [1, 1]} : vector<8x512xf32> to vector<8x128xf32>
    %34 = arith.negf %33 : vector<8x128xf32>
    %35 = math.exp %34 : vector<8x128xf32>
    %cst_17 = arith.constant 1.000000e+00 : f32
    %36 = vector.broadcast %cst_17 : f32 to vector<8x128xf32>
    %37 = arith.addf %36, %35 : vector<8x128xf32>
    %38 = arith.divf %36, %37 : vector<8x128xf32>
    %39 = arith.mulf %30, %11 : vector<8x128xf32>
    %40 = arith.mulf %24, %32 : vector<8x128xf32>
    %41 = arith.addf %39, %40 : vector<8x128xf32>
    %42 = math.tanh %41 : vector<8x128xf32>
    %43 = arith.mulf %38, %42 : vector<8x128xf32>
    %44 = vector.broadcast %c0_i32 : i32 to vector<8x128xi32>
    %45 = arith.cmpi slt, %44, %9 : vector<8x128xi32>
    %46 = arith.select %45, %43, %10 : vector<8x128xi1>, vector<8x128xf32>
    %47 = arith.select %45, %41, %11 : vector<8x128xi1>, vector<8x128xf32>
    %c1_i32 = arith.constant 1 : i32
    %c8_i32_18 = arith.constant 8 : i32
    %48 = arith.muli %c1_i32, %c8_i32_18 : i32
    %49 = arith.index_cast %48 : i32 to index
    %c0_19 = arith.constant 0 : index
    %50 = vector.load %arg8[%49, %c0_19] : memref<64x512xf32, #tpu.memory_space<vmem>>, vector<8x512xf32>
    %51 = arith.truncf %46 : vector<8x128xf32> to vector<8x128xbf16>
    %c0_20 = arith.constant 0 : index
    %c0_21 = arith.constant 0 : index
    %52 = vector.load %arg3[%c0_20, %c0_21] : memref<128x512xbf16, #tpu.memory_space<vmem>>, vector<128x512xbf16>
    %cst_22 = arith.constant dense<0.000000e+00> : vector<8x512xf32>
    %53 = tpu.matmul %51, %52, %cst_22 {dimension_numbers = #tpu.dot_dimension_numbers<[1], [0], [0], [1], [0, 0, 1, 1], [], []>} : vector<8x128xbf16>, vector<128x512xbf16>, vector<8x512xf32> -> vector<8x512xf32>
    %54 = arith.addf %50, %53 : vector<8x512xf32>
    %55 = vector.extract_strided_slice %54 {offsets = [0, 0], sizes = [8, 128], strides = [1, 1]} : vector<8x512xf32> to vector<8x128xf32>
    %56 = arith.negf %55 : vector<8x128xf32>
    %57 = math.exp %56 : vector<8x128xf32>
    %cst_23 = arith.constant 1.000000e+00 : f32
    %58 = vector.broadcast %cst_23 : f32 to vector<8x128xf32>
    %59 = arith.addf %58, %57 : vector<8x128xf32>
    %60 = arith.divf %58, %59 : vector<8x128xf32>
    %61 = vector.extract_strided_slice %54 {offsets = [0, 128], sizes = [8, 128], strides = [1, 1]} : vector<8x512xf32> to vector<8x128xf32>
    %62 = arith.negf %61 : vector<8x128xf32>
    %63 = math.exp %62 : vector<8x128xf32>
    %cst_24 = arith.constant 1.000000e+00 : f32
    %64 = vector.broadcast %cst_24 : f32 to vector<8x128xf32>
    %65 = arith.addf %64, %63 : vector<8x128xf32>
    %66 = arith.divf %64, %65 : vector<8x128xf32>
    %67 = vector.extract_strided_slice %54 {offsets = [0, 256], sizes = [8, 128], strides = [1, 1]} : vector<8x512xf32> to vector<8x128xf32>
    %68 = math.tanh %67 : vector<8x128xf32>
    %69 = vector.extract_strided_slice %54 {offsets = [0, 384], sizes = [8, 128], strides = [1, 1]} : vector<8x512xf32> to vector<8x128xf32>
    %70 = arith.negf %69 : vector<8x128xf32>
    %71 = math.exp %70 : vector<8x128xf32>
    %cst_25 = arith.constant 1.000000e+00 : f32
    %72 = vector.broadcast %cst_25 : f32 to vector<8x128xf32>
    %73 = arith.addf %72, %71 : vector<8x128xf32>
    %74 = arith.divf %72, %73 : vector<8x128xf32>
    %75 = arith.mulf %66, %47 : vector<8x128xf32>
    %76 = arith.mulf %60, %68 : vector<8x128xf32>
    %77 = arith.addf %75, %76 : vector<8x128xf32>
    %78 = math.tanh %77 : vector<8x128xf32>
    %79 = arith.mulf %74, %78 : vector<8x128xf32>
    %80 = vector.broadcast %c1_i32 : i32 to vector<8x128xi32>
    %81 = arith.cmpi slt, %80, %9 : vector<8x128xi32>
    %82 = arith.select %81, %79, %46 : vector<8x128xi1>, vector<8x128xf32>
    %83 = arith.select %81, %77, %47 : vector<8x128xi1>, vector<8x128xf32>
    %c2_i32 = arith.constant 2 : i32
    %c8_i32_26 = arith.constant 8 : i32
    %84 = arith.muli %c2_i32, %c8_i32_26 : i32
    %85 = arith.index_cast %84 : i32 to index
    %c0_27 = arith.constant 0 : index
    %86 = vector.load %arg8[%85, %c0_27] : memref<64x512xf32, #tpu.memory_space<vmem>>, vector<8x512xf32>
    %87 = arith.truncf %82 : vector<8x128xf32> to vector<8x128xbf16>
    %c0_28 = arith.constant 0 : index
    %c0_29 = arith.constant 0 : index
    %88 = vector.load %arg3[%c0_28, %c0_29] : memref<128x512xbf16, #tpu.memory_space<vmem>>, vector<128x512xbf16>
    %cst_30 = arith.constant dense<0.000000e+00> : vector<8x512xf32>
    %89 = tpu.matmul %87, %88, %cst_30 {dimension_numbers = #tpu.dot_dimension_numbers<[1], [0], [0], [1], [0, 0, 1, 1], [], []>} : vector<8x128xbf16>, vector<128x512xbf16>, vector<8x512xf32> -> vector<8x512xf32>
    %90 = arith.addf %86, %89 : vector<8x512xf32>
    %91 = vector.extract_strided_slice %90 {offsets = [0, 0], sizes = [8, 128], strides = [1, 1]} : vector<8x512xf32> to vector<8x128xf32>
    %92 = arith.negf %91 : vector<8x128xf32>
    %93 = math.exp %92 : vector<8x128xf32>
    %cst_31 = arith.constant 1.000000e+00 : f32
    %94 = vector.broadcast %cst_31 : f32 to vector<8x128xf32>
    %95 = arith.addf %94, %93 : vector<8x128xf32>
    %96 = arith.divf %94, %95 : vector<8x128xf32>
    %97 = vector.extract_strided_slice %90 {offsets = [0, 128], sizes = [8, 128], strides = [1, 1]} : vector<8x512xf32> to vector<8x128xf32>
    %98 = arith.negf %97 : vector<8x128xf32>
    %99 = math.exp %98 : vector<8x128xf32>
    %cst_32 = arith.constant 1.000000e+00 : f32
    %100 = vector.broadcast %cst_32 : f32 to vector<8x128xf32>
    %101 = arith.addf %100, %99 : vector<8x128xf32>
    %102 = arith.divf %100, %101 : vector<8x128xf32>
    %103 = vector.extract_strided_slice %90 {offsets = [0, 256], sizes = [8, 128], strides = [1, 1]} : vector<8x512xf32> to vector<8x128xf32>
    %104 = math.tanh %103 : vector<8x128xf32>
    %105 = vector.extract_strided_slice %90 {offsets = [0, 384], sizes = [8, 128], strides = [1, 1]} : vector<8x512xf32> to vector<8x128xf32>
    %106 = arith.negf %105 : vector<8x128xf32>
    %107 = math.exp %106 : vector<8x128xf32>
    %cst_33 = arith.constant 1.000000e+00 : f32
    %108 = vector.broadcast %cst_33 : f32 to vector<8x128xf32>
    %109 = arith.addf %108, %107 : vector<8x128xf32>
    %110 = arith.divf %108, %109 : vector<8x128xf32>
    %111 = arith.mulf %102, %83 : vector<8x128xf32>
    %112 = arith.mulf %96, %104 : vector<8x128xf32>
    %113 = arith.addf %111, %112 : vector<8x128xf32>
    %114 = math.tanh %113 : vector<8x128xf32>
    %115 = arith.mulf %110, %114 : vector<8x128xf32>
    %116 = vector.broadcast %c2_i32 : i32 to vector<8x128xi32>
    %117 = arith.cmpi slt, %116, %9 : vector<8x128xi32>
    %118 = arith.select %117, %115, %82 : vector<8x128xi1>, vector<8x128xf32>
    %119 = arith.select %117, %113, %83 : vector<8x128xi1>, vector<8x128xf32>
    %c3_i32 = arith.constant 3 : i32
    %c8_i32_34 = arith.constant 8 : i32
    %120 = arith.muli %c3_i32, %c8_i32_34 : i32
    %121 = arith.index_cast %120 : i32 to index
    %c0_35 = arith.constant 0 : index
    %122 = vector.load %arg8[%121, %c0_35] : memref<64x512xf32, #tpu.memory_space<vmem>>, vector<8x512xf32>
    %123 = arith.truncf %118 : vector<8x128xf32> to vector<8x128xbf16>
    %c0_36 = arith.constant 0 : index
    %c0_37 = arith.constant 0 : index
    %124 = vector.load %arg3[%c0_36, %c0_37] : memref<128x512xbf16, #tpu.memory_space<vmem>>, vector<128x512xbf16>
    %cst_38 = arith.constant dense<0.000000e+00> : vector<8x512xf32>
    %125 = tpu.matmul %123, %124, %cst_38 {dimension_numbers = #tpu.dot_dimension_numbers<[1], [0], [0], [1], [0, 0, 1, 1], [], []>} : vector<8x128xbf16>, vector<128x512xbf16>, vector<8x512xf32> -> vector<8x512xf32>
    %126 = arith.addf %122, %125 : vector<8x512xf32>
    %127 = vector.extract_strided_slice %126 {offsets = [0, 0], sizes = [8, 128], strides = [1, 1]} : vector<8x512xf32> to vector<8x128xf32>
    %128 = arith.negf %127 : vector<8x128xf32>
    %129 = math.exp %128 : vector<8x128xf32>
    %cst_39 = arith.constant 1.000000e+00 : f32
    %130 = vector.broadcast %cst_39 : f32 to vector<8x128xf32>
    %131 = arith.addf %130, %129 : vector<8x128xf32>
    %132 = arith.divf %130, %131 : vector<8x128xf32>
    %133 = vector.extract_strided_slice %126 {offsets = [0, 128], sizes = [8, 128], strides = [1, 1]} : vector<8x512xf32> to vector<8x128xf32>
    %134 = arith.negf %133 : vector<8x128xf32>
    %135 = math.exp %134 : vector<8x128xf32>
    %cst_40 = arith.constant 1.000000e+00 : f32
    %136 = vector.broadcast %cst_40 : f32 to vector<8x128xf32>
    %137 = arith.addf %136, %135 : vector<8x128xf32>
    %138 = arith.divf %136, %137 : vector<8x128xf32>
    %139 = vector.extract_strided_slice %126 {offsets = [0, 256], sizes = [8, 128], strides = [1, 1]} : vector<8x512xf32> to vector<8x128xf32>
    %140 = math.tanh %139 : vector<8x128xf32>
    %141 = vector.extract_strided_slice %126 {offsets = [0, 384], sizes = [8, 128], strides = [1, 1]} : vector<8x512xf32> to vector<8x128xf32>
    %142 = arith.negf %141 : vector<8x128xf32>
    %143 = math.exp %142 : vector<8x128xf32>
    %cst_41 = arith.constant 1.000000e+00 : f32
    %144 = vector.broadcast %cst_41 : f32 to vector<8x128xf32>
    %145 = arith.addf %144, %143 : vector<8x128xf32>
    %146 = arith.divf %144, %145 : vector<8x128xf32>
    %147 = arith.mulf %138, %119 : vector<8x128xf32>
    %148 = arith.mulf %132, %140 : vector<8x128xf32>
    %149 = arith.addf %147, %148 : vector<8x128xf32>
    %150 = math.tanh %149 : vector<8x128xf32>
    %151 = arith.mulf %146, %150 : vector<8x128xf32>
    %152 = vector.broadcast %c3_i32 : i32 to vector<8x128xi32>
    %153 = arith.cmpi slt, %152, %9 : vector<8x128xi32>
    %154 = arith.select %153, %151, %118 : vector<8x128xi1>, vector<8x128xf32>
    %155 = arith.select %153, %149, %119 : vector<8x128xi1>, vector<8x128xf32>
    %c4_i32 = arith.constant 4 : i32
    %c8_i32_42 = arith.constant 8 : i32
    %156 = arith.muli %c4_i32, %c8_i32_42 : i32
    %157 = arith.index_cast %156 : i32 to index
    %c0_43 = arith.constant 0 : index
    %158 = vector.load %arg8[%157, %c0_43] : memref<64x512xf32, #tpu.memory_space<vmem>>, vector<8x512xf32>
    %159 = arith.truncf %154 : vector<8x128xf32> to vector<8x128xbf16>
    %c0_44 = arith.constant 0 : index
    %c0_45 = arith.constant 0 : index
    %160 = vector.load %arg3[%c0_44, %c0_45] : memref<128x512xbf16, #tpu.memory_space<vmem>>, vector<128x512xbf16>
    %cst_46 = arith.constant dense<0.000000e+00> : vector<8x512xf32>
    %161 = tpu.matmul %159, %160, %cst_46 {dimension_numbers = #tpu.dot_dimension_numbers<[1], [0], [0], [1], [0, 0, 1, 1], [], []>} : vector<8x128xbf16>, vector<128x512xbf16>, vector<8x512xf32> -> vector<8x512xf32>
    %162 = arith.addf %158, %161 : vector<8x512xf32>
    %163 = vector.extract_strided_slice %162 {offsets = [0, 0], sizes = [8, 128], strides = [1, 1]} : vector<8x512xf32> to vector<8x128xf32>
    %164 = arith.negf %163 : vector<8x128xf32>
    %165 = math.exp %164 : vector<8x128xf32>
    %cst_47 = arith.constant 1.000000e+00 : f32
    %166 = vector.broadcast %cst_47 : f32 to vector<8x128xf32>
    %167 = arith.addf %166, %165 : vector<8x128xf32>
    %168 = arith.divf %166, %167 : vector<8x128xf32>
    %169 = vector.extract_strided_slice %162 {offsets = [0, 128], sizes = [8, 128], strides = [1, 1]} : vector<8x512xf32> to vector<8x128xf32>
    %170 = arith.negf %169 : vector<8x128xf32>
    %171 = math.exp %170 : vector<8x128xf32>
    %cst_48 = arith.constant 1.000000e+00 : f32
    %172 = vector.broadcast %cst_48 : f32 to vector<8x128xf32>
    %173 = arith.addf %172, %171 : vector<8x128xf32>
    %174 = arith.divf %172, %173 : vector<8x128xf32>
    %175 = vector.extract_strided_slice %162 {offsets = [0, 256], sizes = [8, 128], strides = [1, 1]} : vector<8x512xf32> to vector<8x128xf32>
    %176 = math.tanh %175 : vector<8x128xf32>
    %177 = vector.extract_strided_slice %162 {offsets = [0, 384], sizes = [8, 128], strides = [1, 1]} : vector<8x512xf32> to vector<8x128xf32>
    %178 = arith.negf %177 : vector<8x128xf32>
    %179 = math.exp %178 : vector<8x128xf32>
    %cst_49 = arith.constant 1.000000e+00 : f32
    %180 = vector.broadcast %cst_49 : f32 to vector<8x128xf32>
    %181 = arith.addf %180, %179 : vector<8x128xf32>
    %182 = arith.divf %180, %181 : vector<8x128xf32>
    %183 = arith.mulf %174, %155 : vector<8x128xf32>
    %184 = arith.mulf %168, %176 : vector<8x128xf32>
    %185 = arith.addf %183, %184 : vector<8x128xf32>
    %186 = math.tanh %185 : vector<8x128xf32>
    %187 = arith.mulf %182, %186 : vector<8x128xf32>
    %188 = vector.broadcast %c4_i32 : i32 to vector<8x128xi32>
    %189 = arith.cmpi slt, %188, %9 : vector<8x128xi32>
    %190 = arith.select %189, %187, %154 : vector<8x128xi1>, vector<8x128xf32>
    %191 = arith.select %189, %185, %155 : vector<8x128xi1>, vector<8x128xf32>
    %c5_i32 = arith.constant 5 : i32
    %c8_i32_50 = arith.constant 8 : i32
    %192 = arith.muli %c5_i32, %c8_i32_50 : i32
    %193 = arith.index_cast %192 : i32 to index
    %c0_51 = arith.constant 0 : index
    %194 = vector.load %arg8[%193, %c0_51] : memref<64x512xf32, #tpu.memory_space<vmem>>, vector<8x512xf32>
    %195 = arith.truncf %190 : vector<8x128xf32> to vector<8x128xbf16>
    %c0_52 = arith.constant 0 : index
    %c0_53 = arith.constant 0 : index
    %196 = vector.load %arg3[%c0_52, %c0_53] : memref<128x512xbf16, #tpu.memory_space<vmem>>, vector<128x512xbf16>
    %cst_54 = arith.constant dense<0.000000e+00> : vector<8x512xf32>
    %197 = tpu.matmul %195, %196, %cst_54 {dimension_numbers = #tpu.dot_dimension_numbers<[1], [0], [0], [1], [0, 0, 1, 1], [], []>} : vector<8x128xbf16>, vector<128x512xbf16>, vector<8x512xf32> -> vector<8x512xf32>
    %198 = arith.addf %194, %197 : vector<8x512xf32>
    %199 = vector.extract_strided_slice %198 {offsets = [0, 0], sizes = [8, 128], strides = [1, 1]} : vector<8x512xf32> to vector<8x128xf32>
    %200 = arith.negf %199 : vector<8x128xf32>
    %201 = math.exp %200 : vector<8x128xf32>
    %cst_55 = arith.constant 1.000000e+00 : f32
    %202 = vector.broadcast %cst_55 : f32 to vector<8x128xf32>
    %203 = arith.addf %202, %201 : vector<8x128xf32>
    %204 = arith.divf %202, %203 : vector<8x128xf32>
    %205 = vector.extract_strided_slice %198 {offsets = [0, 128], sizes = [8, 128], strides = [1, 1]} : vector<8x512xf32> to vector<8x128xf32>
    %206 = arith.negf %205 : vector<8x128xf32>
    %207 = math.exp %206 : vector<8x128xf32>
    %cst_56 = arith.constant 1.000000e+00 : f32
    %208 = vector.broadcast %cst_56 : f32 to vector<8x128xf32>
    %209 = arith.addf %208, %207 : vector<8x128xf32>
    %210 = arith.divf %208, %209 : vector<8x128xf32>
    %211 = vector.extract_strided_slice %198 {offsets = [0, 256], sizes = [8, 128], strides = [1, 1]} : vector<8x512xf32> to vector<8x128xf32>
    %212 = math.tanh %211 : vector<8x128xf32>
    %213 = vector.extract_strided_slice %198 {offsets = [0, 384], sizes = [8, 128], strides = [1, 1]} : vector<8x512xf32> to vector<8x128xf32>
    %214 = arith.negf %213 : vector<8x128xf32>
    %215 = math.exp %214 : vector<8x128xf32>
    %cst_57 = arith.constant 1.000000e+00 : f32
    %216 = vector.broadcast %cst_57 : f32 to vector<8x128xf32>
    %217 = arith.addf %216, %215 : vector<8x128xf32>
    %218 = arith.divf %216, %217 : vector<8x128xf32>
    %219 = arith.mulf %210, %191 : vector<8x128xf32>
    %220 = arith.mulf %204, %212 : vector<8x128xf32>
    %221 = arith.addf %219, %220 : vector<8x128xf32>
    %222 = math.tanh %221 : vector<8x128xf32>
    %223 = arith.mulf %218, %222 : vector<8x128xf32>
    %224 = vector.broadcast %c5_i32 : i32 to vector<8x128xi32>
    %225 = arith.cmpi slt, %224, %9 : vector<8x128xi32>
    %226 = arith.select %225, %223, %190 : vector<8x128xi1>, vector<8x128xf32>
    %227 = arith.select %225, %221, %191 : vector<8x128xi1>, vector<8x128xf32>
    %c6_i32 = arith.constant 6 : i32
    %c8_i32_58 = arith.constant 8 : i32
    %228 = arith.muli %c6_i32, %c8_i32_58 : i32
    %229 = arith.index_cast %228 : i32 to index
    %c0_59 = arith.constant 0 : index
    %230 = vector.load %arg8[%229, %c0_59] : memref<64x512xf32, #tpu.memory_space<vmem>>, vector<8x512xf32>
    %231 = arith.truncf %226 : vector<8x128xf32> to vector<8x128xbf16>
    %c0_60 = arith.constant 0 : index
    %c0_61 = arith.constant 0 : index
    %232 = vector.load %arg3[%c0_60, %c0_61] : memref<128x512xbf16, #tpu.memory_space<vmem>>, vector<128x512xbf16>
    %cst_62 = arith.constant dense<0.000000e+00> : vector<8x512xf32>
    %233 = tpu.matmul %231, %232, %cst_62 {dimension_numbers = #tpu.dot_dimension_numbers<[1], [0], [0], [1], [0, 0, 1, 1], [], []>} : vector<8x128xbf16>, vector<128x512xbf16>, vector<8x512xf32> -> vector<8x512xf32>
    %234 = arith.addf %230, %233 : vector<8x512xf32>
    %235 = vector.extract_strided_slice %234 {offsets = [0, 0], sizes = [8, 128], strides = [1, 1]} : vector<8x512xf32> to vector<8x128xf32>
    %236 = arith.negf %235 : vector<8x128xf32>
    %237 = math.exp %236 : vector<8x128xf32>
    %cst_63 = arith.constant 1.000000e+00 : f32
    %238 = vector.broadcast %cst_63 : f32 to vector<8x128xf32>
    %239 = arith.addf %238, %237 : vector<8x128xf32>
    %240 = arith.divf %238, %239 : vector<8x128xf32>
    %241 = vector.extract_strided_slice %234 {offsets = [0, 128], sizes = [8, 128], strides = [1, 1]} : vector<8x512xf32> to vector<8x128xf32>
    %242 = arith.negf %241 : vector<8x128xf32>
    %243 = math.exp %242 : vector<8x128xf32>
    %cst_64 = arith.constant 1.000000e+00 : f32
    %244 = vector.broadcast %cst_64 : f32 to vector<8x128xf32>
    %245 = arith.addf %244, %243 : vector<8x128xf32>
    %246 = arith.divf %244, %245 : vector<8x128xf32>
    %247 = vector.extract_strided_slice %234 {offsets = [0, 256], sizes = [8, 128], strides = [1, 1]} : vector<8x512xf32> to vector<8x128xf32>
    %248 = math.tanh %247 : vector<8x128xf32>
    %249 = vector.extract_strided_slice %234 {offsets = [0, 384], sizes = [8, 128], strides = [1, 1]} : vector<8x512xf32> to vector<8x128xf32>
    %250 = arith.negf %249 : vector<8x128xf32>
    %251 = math.exp %250 : vector<8x128xf32>
    %cst_65 = arith.constant 1.000000e+00 : f32
    %252 = vector.broadcast %cst_65 : f32 to vector<8x128xf32>
    %253 = arith.addf %252, %251 : vector<8x128xf32>
    %254 = arith.divf %252, %253 : vector<8x128xf32>
    %255 = arith.mulf %246, %227 : vector<8x128xf32>
    %256 = arith.mulf %240, %248 : vector<8x128xf32>
    %257 = arith.addf %255, %256 : vector<8x128xf32>
    %258 = math.tanh %257 : vector<8x128xf32>
    %259 = arith.mulf %254, %258 : vector<8x128xf32>
    %260 = vector.broadcast %c6_i32 : i32 to vector<8x128xi32>
    %261 = arith.cmpi slt, %260, %9 : vector<8x128xi32>
    %262 = arith.select %261, %259, %226 : vector<8x128xi1>, vector<8x128xf32>
    %263 = arith.select %261, %257, %227 : vector<8x128xi1>, vector<8x128xf32>
    %c7_i32 = arith.constant 7 : i32
    %c8_i32_66 = arith.constant 8 : i32
    %264 = arith.muli %c7_i32, %c8_i32_66 : i32
    %265 = arith.index_cast %264 : i32 to index
    %c0_67 = arith.constant 0 : index
    %266 = vector.load %arg8[%265, %c0_67] : memref<64x512xf32, #tpu.memory_space<vmem>>, vector<8x512xf32>
    %267 = arith.truncf %262 : vector<8x128xf32> to vector<8x128xbf16>
    %c0_68 = arith.constant 0 : index
    %c0_69 = arith.constant 0 : index
    %268 = vector.load %arg3[%c0_68, %c0_69] : memref<128x512xbf16, #tpu.memory_space<vmem>>, vector<128x512xbf16>
    %cst_70 = arith.constant dense<0.000000e+00> : vector<8x512xf32>
    %269 = tpu.matmul %267, %268, %cst_70 {dimension_numbers = #tpu.dot_dimension_numbers<[1], [0], [0], [1], [0, 0, 1, 1], [], []>} : vector<8x128xbf16>, vector<128x512xbf16>, vector<8x512xf32> -> vector<8x512xf32>
    %270 = arith.addf %266, %269 : vector<8x512xf32>
    %271 = vector.extract_strided_slice %270 {offsets = [0, 0], sizes = [8, 128], strides = [1, 1]} : vector<8x512xf32> to vector<8x128xf32>
    %272 = arith.negf %271 : vector<8x128xf32>
    %273 = math.exp %272 : vector<8x128xf32>
    %cst_71 = arith.constant 1.000000e+00 : f32
    %274 = vector.broadcast %cst_71 : f32 to vector<8x128xf32>
    %275 = arith.addf %274, %273 : vector<8x128xf32>
    %276 = arith.divf %274, %275 : vector<8x128xf32>
    %277 = vector.extract_strided_slice %270 {offsets = [0, 128], sizes = [8, 128], strides = [1, 1]} : vector<8x512xf32> to vector<8x128xf32>
    %278 = arith.negf %277 : vector<8x128xf32>
    %279 = math.exp %278 : vector<8x128xf32>
    %cst_72 = arith.constant 1.000000e+00 : f32
    %280 = vector.broadcast %cst_72 : f32 to vector<8x128xf32>
    %281 = arith.addf %280, %279 : vector<8x128xf32>
    %282 = arith.divf %280, %281 : vector<8x128xf32>
    %283 = vector.extract_strided_slice %270 {offsets = [0, 256], sizes = [8, 128], strides = [1, 1]} : vector<8x512xf32> to vector<8x128xf32>
    %284 = math.tanh %283 : vector<8x128xf32>
    %285 = vector.extract_strided_slice %270 {offsets = [0, 384], sizes = [8, 128], strides = [1, 1]} : vector<8x512xf32> to vector<8x128xf32>
    %286 = arith.negf %285 : vector<8x128xf32>
    %287 = math.exp %286 : vector<8x128xf32>
    %cst_73 = arith.constant 1.000000e+00 : f32
    %288 = vector.broadcast %cst_73 : f32 to vector<8x128xf32>
    %289 = arith.addf %288, %287 : vector<8x128xf32>
    %290 = arith.divf %288, %289 : vector<8x128xf32>
    %291 = arith.mulf %282, %263 : vector<8x128xf32>
    %292 = arith.mulf %276, %284 : vector<8x128xf32>
    %293 = arith.addf %291, %292 : vector<8x128xf32>
    %294 = math.tanh %293 : vector<8x128xf32>
    %295 = arith.mulf %290, %294 : vector<8x128xf32>
    %296 = vector.broadcast %c7_i32 : i32 to vector<8x128xi32>
    %297 = arith.cmpi slt, %296, %9 : vector<8x128xi32>
    %298 = arith.select %297, %295, %262 : vector<8x128xi1>, vector<8x128xf32>
    %299 = arith.select %297, %293, %263 : vector<8x128xi1>, vector<8x128xf32>
    %c8_i32_74 = arith.constant 8 : i32
    %300 = arith.truncf %298 : vector<8x128xf32> to vector<8x128xbf16>
    %c0_75 = arith.constant 0 : index
    %c0_76 = arith.constant 0 : index
    %301 = vector.load %arg5[%c0_75, %c0_76] : memref<128x128xbf16, #tpu.memory_space<vmem>>, vector<128x128xbf16>
    %cst_77 = arith.constant dense<0.000000e+00> : vector<8x128xf32>
    %302 = tpu.matmul %300, %301, %cst_77 {dimension_numbers = #tpu.dot_dimension_numbers<[1], [0], [0], [1], [0, 0, 1, 1], [], []>} : vector<8x128xbf16>, vector<128x128xbf16>, vector<8x128xf32> -> vector<8x128xf32>
    %c0_78 = arith.constant 0 : index
    %c0_79 = arith.constant 0 : index
    %303 = vector.load %arg6[%c0_78, %c0_79] : memref<1x128xf32, #tpu.memory_space<vmem>>, vector<1x128xf32>
    %304 = vector.broadcast %303 : vector<1x128xf32> to vector<8x128xf32>
    %305 = arith.addf %302, %304 : vector<8x128xf32>
    %c0_80 = arith.constant 0 : index
    %c0_81 = arith.constant 0 : index
    %306 = vector.load %arg7[%c0_80, %c0_81] : memref<8x128xf32, #tpu.memory_space<vmem>>, vector<8x128xf32>
    tpu.vector_store %arg7[%c0_80, %c0_81], %305 {strides = array<i32>} : memref<8x128xf32, #tpu.memory_space<vmem>>, vector<8x128xf32>,
    return
  }
}

</mosaic_0001>

<bundles_post_ra>
// kernel: tpu_custom_call.1
= control target key start
LH: loop header
LB: loop body
LE: loop exit
PB: predicated region body
PF: predicated region fallthrough
CT: control target
= control target key end

     0   :  { %12 = vsyncpa [#allocation4], 0  ;;  %s2783_s0 = inlined_call_operand.vmem [shape: bf16[64,32], index: 0, kind: input, shape index: {}]   ;;  %s2784_s1 = inlined_call_operand.vmem [shape: s32[8,1], index: 1, kind: input, shape index: {}]   ;;  %s2785_s2 = inlined_call_operand.vmem [shape: bf16[32,512], index: 2, kind: input, shape index: {}]   ;;  %s2786_s3 = inlined_call_operand.hbm [shape: bf16[128,512], index: 3, kind: input, shape index: {}]   ;;  %s2787_s4 = inlined_call_operand.vmem [shape: f32[1,512], index: 4, kind: input, shape index: {}]   ;;  %s2788_s5 = inlined_call_operand.hbm [shape: bf16[128,128], index: 5, kind: input, shape index: {}]   ;;  %s2789_s6 = inlined_call_operand.vmem [shape: f32[1,128], index: 6, kind: input, shape index: {}]   ;;  %s2790_s7 = inlined_call_operand.hbm [shape: f32[8,128], index: 7, kind: output, shape index: {}]  }
   0x1   :  { %13 = vsyncpa [#allocation7], 0 }
   0x2   :  { %14 = vsyncpa [#allocation5], 0  ;;  %s2047_s24 = smov [#allocation3]   ;;  %s1975_s28 = scalar_lea.hbm %s2786_s3, 4096 }
   0x3   :  { %s26_s25 = sshll.u32 %s2047_s24, 4  ;;  %p1976_p0 = scmp.ne.s32.totalorder %s2786_s3, %s1975_s28  ;;  %s27_s25 = int_to_ptr.vmem [resolvable:$true] %s26_s25 }
   0x4   :  { %p1979_p1 = scmp.lt.u32.totalorder %s1975_s28, %s2786_s3 }
   0x6   :  { %p1981_p2 = pnand %p1979_p1, %p1976_p0 }
   0x8   :  { %1984 = shalt.err (!%p1981_p2)
}
   0x9   :  { %s1985_s10 = scalar_lea.vmem %s27_s25, 4096  ;;  %p1990_p4 = scmp.lt.s32.totalorder %s27_s25, %s27_s25 }
   0xa   :  { %p1986_p3 = scmp.ne.s32.totalorder %s27_s25, %s1985_s10  ;;  %p1991_p5 = scmp.lt.s32.totalorder %s1985_s10, %s1985_s10 }
   0xc   :  { %p1992_p6 = por %p1991_p5, %p1990_p4 }
   0xe   :  { %p1993_p7 = pnand %p1992_p6, %p1986_p3 }
  0x10   :  { %1996 = shalt.err (!%p1993_p7)
}
  0x11   :  { %s2048_s11 = smov 256   ;;  %s2049_s12 = smov 16  }
  0x12   :  { %32 = dma.hbm_to_vmem [thread:$0]  %s2786_s3, 4096, %s27_s25, [#allocation4], %s2048_s11, %s2048_s11, %s2049_s12  }
  0x13   :  { %s2050_s15 = smov [#allocation6]   ;;  %s1997_s19 = scalar_lea.hbm %s2788_s5, 1024 }
  0x14   :  { %s40_s16 = sshll.u32 %s2050_s15, 4  ;;  %p1998_p8 = scmp.ne.s32.totalorder %s2788_s5, %s1997_s19  ;;  %s41_s16 = int_to_ptr.vmem [resolvable:$true] %s40_s16 }
  0x15   :  { %p2001_p9 = scmp.lt.u32.totalorder %s1997_s19, %s2788_s5 }
  0x17   :  { %p2003_p10 = pnand %p2001_p9, %p1998_p8 }
  0x19   :  { %2006 = shalt.err (!%p2003_p10)
}
  0x1a   :  { %s2007_s24 = scalar_lea.vmem %s41_s16, 1024  ;;  %p2012_p12 = scmp.lt.s32.totalorder %s41_s16, %s41_s16 }
  0x1b   :  { %p2008_p11 = scmp.ne.s32.totalorder %s41_s16, %s2007_s24  ;;  %p2013_p13 = scmp.lt.s32.totalorder %s2007_s24, %s2007_s24 }
  0x1d   :  { %p2014_p0 = por %p2013_p13, %p2012_p12 }
  0x1f   :  { %p2015_p1 = pnand %p2014_p0, %p2008_p11 }
  0x21   :  { %2018 = shalt.err (!%p2015_p1)
}
  0x22   :  { %s2051_s3 = smov 64   ;;  %s2052_s25 = smov 4  }
  0x23   :  { %46 = dma.hbm_to_vmem [thread:$0]  %s2788_s5, 1024, %s41_s16, [#allocation7], %s2051_s3, %s2051_s3, %s2052_s25  }
  0x24   :  { %2041 = dma.done.wait [#allocation4], 4096  }
  0x25   :  { %2042 = vsyncadd [#allocation4], 4294963200 }
  0x26   :  { %2043 = dma.done.wait [#allocation7], 1024  }
  0x27   :  { %2044 = vsyncadd [#allocation7], 4294966272  ;;  %v2791_v0 = vmov 0   ;;  %v1743_v1 = vld [vmem:[%s2785_s2 + $0x4] ss:$16 sps:$4 sm:$0xff]   ;;  %vm154_vm0 = vcmask 261120   ;;  %v74_v46 = vlaneseq }
  0x28   :  { %199 = vmatprep.mubr.bf16.mxu0 %v2791_v0  ;;  %272 = vmatprep.mubr.bf16.mxu1 %v2791_v0  ;;  %v1745_v2 = vld [vmem:[%s2785_s2 + $0xc] ss:$16 sps:$4 sm:$0xff]   ;;  %v1747_v3 = vld [vmem:[%s2785_s2] ss:$16 sps:$4 sm:$0xff]   ;;  %v1748_v4 = vld [vmem:[%s2785_s2 + $0x8] ss:$16 sps:$4 sm:$0xff]  }
  0x29   :  { %1742 = vset.pattern.permute.xlu0 %v2791_v0  ;;  %167 = vmatprep.subr.bf16.mxu0 %v1743_v1  ;;  %v1749_v5 = vld [vmem:[%s2785_s2 + $0x24] ss:$16 sps:$4 sm:$0xff]   ;;  %v1751_v6 = vld [vmem:[%s2785_s2 + $0x2c] ss:$16 sps:$4 sm:$0xff]   ;;  %v1753_v7 = vld [vmem:[%s2785_s2 + $0x20] ss:$16 sps:$4 sm:$0xff]  }
  0x2a   :  { %240 = vmatprep.subr.bf16.mxu1 %v1745_v2  ;;  %168 = vmatpush1.bf16.msra.mxu0 %v1747_v3  ;;  %v1754_v8 = vld [vmem:[%s2785_s2 + $0x28] ss:$16 sps:$4 sm:$0xff]   ;;  %v1755_v9 = vld [vmem:[%s2783_s0] sm:$0xff]   ;;  %v2153_v11 = vld [vmem:[#allocation3 + $0xc] ss:$16 sps:$4 sm:$0xff]   ;;  %v75_v47 = vshrl.u32 %v74_v46, 7 }
  0x2b   :  { %241 = vmatpush1.bf16.msra.mxu1 %v1748_v4  ;;  %169 = vmatprep.subr.bf16.mxu0 %v1749_v5  ;;  %v2151_v10 = vld [vmem:[#allocation3 + $0x4] ss:$16 sps:$4 sm:$0xff]   ;;  %v2155_v12 = vld [vmem:[#allocation3] ss:$16 sps:$4 sm:$0xff]   ;;  %v2157_v13 = vld [vmem:[#allocation3 + $0x8] ss:$16 sps:$4 sm:$0xff]  }
  0x2c   :  { %242 = vmatprep.subr.bf16.mxu1 %v1751_v6  ;;  %v2160_v14 = vld [vmem:[#allocation3 + $0x24] ss:$16 sps:$4 sm:$0xff]   ;;  %v2163_v15 = vld [vmem:[#allocation3 + $0x2c] ss:$16 sps:$4 sm:$0xff]   ;;  %v2167_v16 = vld [vmem:[#allocation3 + $0x20] ss:$16 sps:$4 sm:$0xff]  }
  0x2d   :  { %v2171_v17 = vld [vmem:[#allocation3 + $0x28] ss:$16 sps:$4 sm:$0xff]   ;;  %v2175_v18 = vld [vmem:[#allocation3 + $0x44] ss:$16 sps:$4 sm:$0xff]   ;;  %v2182_v20 = vld [vmem:[#allocation3 + $0x4c] ss:$16 sps:$4 sm:$0xff]  }
  0x2e   :  { %170 = vmatpush1.bf16.msra.mxu0 %v1753_v7  ;;  %v1768_v19 = vld [vmem:[%s2783_s0 + $0x8] sm:$0xff]   ;;  %v2184_v21 = vld [vmem:[#allocation3 + $0x40] ss:$16 sps:$4 sm:$0xff]   ;;  %v2192_v23 = vld [vmem:[#allocation3 + $0x64] ss:$16 sps:$4 sm:$0xff]   ;;  %v84_v48 = vsub.s32 2, %v75_v47 }
  0x2f   :  { %243 = vmatpush1.bf16.msra.mxu1 %v1754_v8  ;;  %545 = vmatprep.subr.bf16.mxu0 %v2151_v10  ;;  %v2188_v22 = vld [vmem:[#allocation3 + $0x48] ss:$16 sps:$4 sm:$0xff]   ;;  %v2194_v24 = vld [vmem:[#allocation3 + $0x6c] ss:$16 sps:$4 sm:$0xff]   ;;  %v2198_v25 = vld [vmem:[#allocation3 + $0x60] ss:$16 sps:$4 sm:$0xff]  }
  0x30   :  { %586 = vmatprep.subr.bf16.mxu1 %v2153_v11  ;;  %v2202_v26 = vld [vmem:[#allocation3 + $0x68] ss:$16 sps:$4 sm:$0xff]   ;;  %v2206_v27 = vld [vmem:[#allocation3 + $0x84] ss:$16 sps:$4 sm:$0xff]   ;;  %v2208_v28 = vld [vmem:[#allocation3 + $0x8c] ss:$16 sps:$4 sm:$0xff]  }
  0x31   :  { %1624 = vmatmul.mubr.msk.bf16.vlgmr.msra.gmra.mrb[0].mxu0 %vm154_vm0, %v1755_v9  ;;  %v1781_v29 = vld [vmem:[%s2783_s0 + $0x10] sm:$0xff]   ;;  %v2217_v31 = vld [vmem:[#allocation3 + $0x88] ss:$16 sps:$4 sm:$0xff]   ;;  %v2225_v33 = vld [vmem:[#allocation3 + $0xac] ss:$16 sps:$4 sm:$0xff]   ;;  %v88_v49 = vsub.s32 3, %v75_v47 }
  0x32   :  { %1628 = vmatmul.mubr.msk.bf16.vlgmr.msra.gmra.mrb[0].mxu1 %vm154_vm0, %v1755_v9  ;;  %546 = vmatpush1.bf16.msra.mxu0 %v2155_v12  ;;  %v2215_v30 = vld [vmem:[#allocation3 + $0x80] ss:$16 sps:$4 sm:$0xff]   ;;  %v2221_v32 = vld [vmem:[#allocation3 + $0xa4] ss:$16 sps:$4 sm:$0xff]   ;;  %v2231_v35 = vld [vmem:[#allocation3 + $0xa8] ss:$16 sps:$4 sm:$0xff]  }
  0x33   :  { %587 = vmatpush1.bf16.msra.mxu1 %v2157_v13  ;;  %547 = vmatprep.subr.bf16.mxu0 %v2160_v14  ;;  %v2229_v34 = vld [vmem:[#allocation3 + $0xa0] ss:$16 sps:$4 sm:$0xff]   ;;  %v2235_v36 = vld [vmem:[#allocation3 + $0xc4] ss:$16 sps:$4 sm:$0xff]   ;;  %v1794_v37 = vld [vmem:[%s2783_s0 + $0x18] sm:$0xff]   ;;  %v76_v50 = vsub.s32 0, %v75_v47 }
  0x34   :  { %588 = vmatprep.subr.bf16.mxu1 %v2163_v15  ;;  %209 = vmatprep.mubr.bf16.mxu0 %v2791_v0  ;;  %v2242_v38 = vld [vmem:[#allocation3 + $0xcc] ss:$16 sps:$4 sm:$0xff]   ;;  %v2246_v39 = vld [vmem:[#allocation3 + $0xc0] ss:$16 sps:$4 sm:$0xff]   ;;  %v2248_v40 = vld [vmem:[#allocation3 + $0xc8] ss:$16 sps:$4 sm:$0xff]  }
  0x35   :  { %282 = vmatprep.mubr.bf16.mxu1 %v2791_v0  ;;  %v345_v41 = vld [vmem:[%s2784_s1] sm:$0xff]  ;;  %v2255_v43 = vld [vmem:[#allocation3 + $0xec] ss:$16 sps:$4 sm:$0xff]   ;;  %v2267_v45 = vld [vmem:[#allocation3 + $0xe8] ss:$16 sps:$4 sm:$0xff]   ;;  %v80_v52 = vsub.s32 1, %v75_v47 }
  0x36   :  { %548 = vmatpush1.bf16.msra.mxu0 %v2167_v16  ;;  %v2253_v42 = vld [vmem:[#allocation3 + $0xe4] ss:$16 sps:$4 sm:$0xff]   ;;  %347 = vperm.xlu0 %1742, %v345_v41   ;;  %v2261_v44 = vld [vmem:[#allocation3 + $0xe0] ss:$16 sps:$4 sm:$0xff]   ;;  %vm2055_vm9 = vmmov 0   ;;  %s2056_s29 = smov [#allocation8]  }
  0x37   :  { %589 = vmatpush1.bf16.msra.mxu1 %v2171_v17  ;;  %549 = vmatprep.subr.bf16.mxu0 %v2175_v18  ;;  %v72_v51 = vld [vmem:[%s2787_s4] sm:$0xf]  ;;  %s1602_s30 = sshll.u32 %s2056_s29, 4  ;;  %s1603_s30 = int_to_ptr.vmem [resolvable:$true] %s1602_s30 }
  0x38   :  { %590 = vmatprep.subr.bf16.mxu1 %v2182_v20  ;;  %v2316_v53 = vrot.slane %v72_v51, %v84_v48  ;;  %v2322_v56 = vrot.slane %v72_v51, %v88_v49  ;;  %v77_v57 = vrot.slane %v72_v51, %v76_v50  ;;  %v81_v60 = vrot.slane %v72_v51, %v80_v52  ;;  %s2019_s8 = scalar_lea.vmem %s1603_s30, 128  ;;  %p2024_p3 = scmp.lt.s32.totalorder %s1603_s30, %s1603_s30 }
  0x39   :  { %1625 = vmatmul.mubr.msk.bf16.gmra.mrb[4].mxu0 %vm154_vm0, %v1768_v19  ;;  %p2020_p2 = scmp.ne.s32.totalorder %s1603_s30, %s2019_s8  ;;  %p2025_p4 = scmp.lt.s32.totalorder %s2019_s8, %s2019_s8 }
  0x3a   :  { %1629 = vmatmul.mubr.msk.bf16.gmra.mrb[4].mxu1 %vm154_vm0, %v1768_v19  ;;  %550 = vmatpush1.bf16.msra.mxu0 %v2184_v21 }
  0x3b   :  { %591 = vmatpush1.bf16.msra.mxu1 %v2188_v22  ;;  %551 = vmatprep.subr.bf16.mxu0 %v2192_v23  ;;  %p2026_p5 = por %p2025_p4, %p2024_p3 }
  0x3c   :  { %592 = vmatprep.subr.bf16.mxu1 %v2194_v24  ;;  %219 = vmatprep.mubr.bf16.mxu0 %v2791_v0 }
  0x3d   :  { %292 = vmatprep.mubr.bf16.mxu1 %v2791_v0  ;;  %p2027_p6 = pnand %p2026_p5, %p2020_p2 }
  0x3e   :  { %552 = vmatpush1.bf16.msra.mxu0 %v2198_v25 }
  0x3f   :  { %593 = vmatpush1.bf16.msra.mxu1 %v2202_v26  ;;  %553 = vmatprep.subr.bf16.mxu0 %v2206_v27 }
  0x40   :  { %594 = vmatprep.subr.bf16.mxu1 %v2208_v28 }
  0x41   :  { %1626 = vmatmul.mubr.msk.bf16.gmra.mrb[8].mxu0 %vm154_vm0, %v1781_v29 }
  0x42   :  { %1630 = vmatmul.mubr.msk.bf16.gmra.mrb[8].mxu1 %vm154_vm0, %v1781_v29  ;;  %554 = vmatpush1.bf16.msra.mxu0 %v2215_v30 }
  0x43   :  { %595 = vmatpush1.bf16.msra.mxu1 %v2217_v31  ;;  %555 = vmatprep.subr.bf16.mxu0 %v2221_v32 }
  0x44   :  { %596 = vmatprep.subr.bf16.mxu1 %v2225_v33  ;;  %229 = vmatprep.mubr.bf16.mxu0 %v2791_v0 }
  0x45   :  { %302 = vmatprep.mubr.bf16.mxu1 %v2791_v0 }
  0x46   :  { %556 = vmatpush1.bf16.msra.mxu0 %v2229_v34 }
  0x47   :  { %597 = vmatpush1.bf16.msra.mxu1 %v2231_v35  ;;  %557 = vmatprep.subr.bf16.mxu0 %v2235_v36 }
  0x48   :  { %598 = vmatprep.subr.bf16.mxu1 %v2242_v38 }
  0x49   :  { %1627 = vmatmul.mubr.msk.bf16.gmra.mrb[12].mxu0 %vm154_vm0, %v1794_v37 }
  0x4a   :  { %1631 = vmatmul.mubr.msk.bf16.gmra.mrb[12].mxu1 %vm154_vm0, %v1794_v37  ;;  %558 = vmatpush1.bf16.msra.mxu0 %v2246_v39 }
  0x4b   :  { %599 = vmatpush1.bf16.msra.mxu1 %v2248_v40  ;;  %559 = vmatprep.subr.bf16.mxu0 %v2253_v42 }
  0x4c   :  { %600 = vmatprep.subr.bf16.mxu1 %v2255_v43  ;;  %577 = vmatprep.mubr.bf16.mxu0 %v2791_v0 }
  0x4d   :  { %618 = vmatprep.mubr.bf16.mxu1 %v2791_v0 }
  0x4e   :  { %560 = vmatpush1.bf16.msra.mxu0 %v2261_v44 }
  0x4f   :  { %601 = vmatpush1.bf16.msra.mxu1 %v2267_v45  ;;  %663 = vmatprep.subr.bf16.mxu0 %v2151_v10 }
  0x50   :  { %704 = vmatprep.subr.bf16.mxu1 %v2153_v11 }
  0x51   :  { %578 = vmatmul.mubr.bf16.vlgmr.msra.gmra.mrb[16].mxu0 %v2791_v0 }
  0x52   :  { %619 = vmatmul.mubr.bf16.vlgmr.msra.gmra.mrb[16].mxu1 %v2791_v0  ;;  %664 = vmatpush1.bf16.msra.mxu0 %v2155_v12 }
  0x53   :  { %705 = vmatpush1.bf16.msra.mxu1 %v2157_v13  ;;  %665 = vmatprep.subr.bf16.mxu0 %v2160_v14 }
  0x54   :  { %706 = vmatprep.subr.bf16.mxu1 %v2163_v15  ;;  %695 = vmatprep.mubr.bf16.mxu0 %v2791_v0 }
  0x55   :  { %736 = vmatprep.mubr.bf16.mxu1 %v2791_v0 }
  0x56   :  { %666 = vmatpush1.bf16.msra.mxu0 %v2167_v16 }
  0x57   :  { %707 = vmatpush1.bf16.msra.mxu1 %v2171_v17  ;;  %667 = vmatprep.subr.bf16.mxu0 %v2175_v18 }
  0x58   :  { %708 = vmatprep.subr.bf16.mxu1 %v2182_v20 }
  0x5a   :  { %668 = vmatpush1.bf16.msra.mxu0 %v2184_v21 }
  0x5b   :  { %709 = vmatpush1.bf16.msra.mxu1 %v2188_v22  ;;  %669 = vmatprep.subr.bf16.mxu0 %v2192_v23 }
  0x5c   :  { %710 = vmatprep.subr.bf16.mxu1 %v2194_v24 }
  0x5e   :  { %670 = vmatpush1.bf16.msra.mxu0 %v2198_v25 }
  0x5f   :  { %711 = vmatpush1.bf16.msra.mxu1 %v2202_v26  ;;  %671 = vmatprep.subr.bf16.mxu0 %v2206_v27 }
  0x60   :  { %712 = vmatprep.subr.bf16.mxu1 %v2208_v28 }
  0x62   :  { %672 = vmatpush1.bf16.msra.mxu0 %v2215_v30 }
  0x63   :  { %713 = vmatpush1.bf16.msra.mxu1 %v2217_v31  ;;  %673 = vmatprep.subr.bf16.mxu0 %v2221_v32 }
  0x64   :  { %714 = vmatprep.subr.bf16.mxu1 %v2225_v33 }
  0x66   :  { %674 = vmatpush1.bf16.msra.mxu0 %v2229_v34 }
  0x67   :  { %715 = vmatpush1.bf16.msra.mxu1 %v2231_v35  ;;  %675 = vmatprep.subr.bf16.mxu0 %v2235_v36 }
  0x68   :  { %716 = vmatprep.subr.bf16.mxu1 %v2242_v38 }
  0x6a   :  { %676 = vmatpush1.bf16.msra.mxu0 %v2246_v39 }
  0x6b   :  { %717 = vmatpush1.bf16.msra.mxu1 %v2248_v40  ;;  %677 = vmatprep.subr.bf16.mxu0 %v2253_v42 }
  0x6c   :  { %718 = vmatprep.subr.bf16.mxu1 %v2255_v43 }
  0x6e   :  { %678 = vmatpush1.bf16.msra.mxu0 %v2261_v44 }
  0x6f   :  { %719 = vmatpush1.bf16.msra.mxu1 %v2267_v45  ;;  %781 = vmatprep.subr.bf16.mxu0 %v2151_v10 }
  0x70   :  { %822 = vmatprep.subr.bf16.mxu1 %v2153_v11 }
 0x104   :  { %v2318_v54 = vpop.f32.mrb[0].mxu0 }
 0x105   :  { %v2320_v55 = vpop.f32.mrb[0].mxu1  ;;  %v203_v58 = vpop.f32.mrb[1].mxu0 }
 0x106   :  { %v276_v59 = vpop.f32.mrb[1].mxu1  ;;  %v205_v61 = vpop.f32.mrb[2].mxu0 }
 0x107   :  { %v278_v62 = vpop.f32.mrb[2].mxu1  ;;  %v2324_v63 = vadd.f32 %v205_v61, %v77_v57  ;;  %v207_v1 = vpop.f32.mrb[3].mxu0 }
 0x108   :  { %v2327_v2 = vadd.f32 %v278_v62, %v2316_v53  ;;  %v280_v3 = vpop.f32.mrb[3].mxu1  ;;  %v2329_v4 = vadd.f32 %v207_v1, %v81_v60 }
 0x109   :  { %v2332_v5 = vadd.f32 %v280_v3, %v2322_v56 }
 0x10c   :  { %v211_v6 = vpop.f32.mrb[4].mxu0 }
 0x10d   :  { %v284_v7 = vpop.f32.mrb[4].mxu1  ;;  %v2334_v8 = vadd.f32 %v211_v6, %v77_v57  ;;  %v213_v9 = vpop.f32.mrb[5].mxu0 }
 0x10e   :  { %v2337_v19 = vadd.f32 %v284_v7, %v2316_v53  ;;  %v286_v29 = vpop.f32.mrb[5].mxu1  ;;  %v2339_v37 = vadd.f32 %v213_v9, %v81_v60  ;;  %v215_v41 = vpop.f32.mrb[6].mxu0 }
 0x10f   :  { %v2342_v46 = vadd.f32 %v286_v29, %v2322_v56  ;;  %v288_v47 = vpop.f32.mrb[6].mxu1  ;;  %v2344_v48 = vadd.f32 %v215_v41, %v77_v57  ;;  %v217_v49 = vpop.f32.mrb[7].mxu0 }
 0x110   :  { %v2347_v50 = vadd.f32 %v288_v47, %v2316_v53  ;;  %v290_v51 = vpop.f32.mrb[7].mxu1  ;;  %v2349_v52 = vadd.f32 %v217_v49, %v81_v60 }
 0x111   :  { %2793 = vst [vmem:[#allocation12_spill] sm:$0xff] %v2342_v46  ;;  %2794 = vst [vmem:[#allocation13_spill] sm:$0xff] %v2344_v48  ;;  %v2352_v61 = vadd.f32 %v290_v51, %v2322_v56 }
 0x112   :  { %2795 = vst [vmem:[#allocation14_spill] sm:$0xff] %v2347_v50  ;;  %2796 = vst [vmem:[#allocation15_spill] sm:$0xff] %v2349_v52 }
 0x113   :  { %2797 = vst [vmem:[#allocation16_spill] sm:$0xff] %v2352_v61 }
 0x114   :  { %v221_v62 = vpop.f32.mrb[8].mxu0 }
 0x115   :  { %v294_v1 = vpop.f32.mrb[8].mxu1  ;;  %v2354_v3 = vadd.f32 %v221_v62, %v77_v57  ;;  %v223_v6 = vpop.f32.mrb[9].mxu0 }
 0x116   :  { %v2357_v7 = vadd.f32 %v294_v1, %v2316_v53  ;;  %v296_v9 = vpop.f32.mrb[9].mxu1  ;;  %v2359_v29 = vadd.f32 %v223_v6, %v81_v60  ;;  %v225_v41 = vpop.f32.mrb[10].mxu0 }
 0x117   :  { %2798 = vst [vmem:[#allocation17_spill] sm:$0xff] %v2354_v3  ;;  %v2362_v47 = vadd.f32 %v296_v9, %v2322_v56  ;;  %v298_v49 = vpop.f32.mrb[10].mxu1  ;;  %v2364_v0 = vadd.f32 %v225_v41, %v77_v57  ;;  %v227_v51 = vpop.f32.mrb[11].mxu0 }
 0x118   :  { %2799 = vst [vmem:[#allocation18_spill] sm:$0xff] %v2357_v7  ;;  %2800 = vst [vmem:[#allocation19_spill] sm:$0xff] %v2359_v29  ;;  %v2367_v61 = vadd.f32 %v298_v49, %v2316_v53  ;;  %v300_v62 = vpop.f32.mrb[11].mxu1  ;;  %v2369_v3 = vadd.f32 %v227_v51, %v81_v60 }
 0x119   :  { %2801 = vst [vmem:[#allocation20_spill] sm:$0xff] %v2362_v47  ;;  %2802 = vst [vmem:[#allocation21_spill] sm:$0xff] %v2364_v0  ;;  %v2372_v1 = vadd.f32 %v300_v62, %v2322_v56 }
 0x11a   :  { %2803 = vst [vmem:[#allocation22_spill] sm:$0xff] %v2367_v61  ;;  %2804 = vst [vmem:[#allocation23_spill] sm:$0xff] %v2369_v3 }
 0x11b   :  { %2805 = vst [vmem:[#allocation24_spill] sm:$0xff] %v2372_v1 }
 0x11c   :  { %v231_v7 = vpop.f32.mrb[12].mxu0 }
 0x11d   :  { %v304_v6 = vpop.f32.mrb[12].mxu1  ;;  %v2374_v29 = vadd.f32 %v231_v7, %v77_v57  ;;  %v233_v52 = vpop.f32.mrb[13].mxu0 }
 0x11e   :  { %v2377_v9 = vadd.f32 %v304_v6, %v2316_v53  ;;  %v306_v41 = vpop.f32.mrb[13].mxu1  ;;  %v2379_v0 = vadd.f32 %v233_v52, %v81_v60  ;;  %v235_v47 = vpop.f32.mrb[14].mxu0  ;;  %v202_v52 = vadd.f32 %v2318_v54, %v77_v57 }
 0x11f   :  { %2806 = vst [vmem:[#allocation25_spill] sm:$0xff] %v2374_v29  ;;  %v2382_v49 = vadd.f32 %v306_v41, %v2322_v56  ;;  %v308_v51 = vpop.f32.mrb[14].mxu1  ;;  %v2384_v3 = vadd.f32 %v235_v47, %v77_v57  ;;  %v237_v62 = vpop.f32.mrb[15].mxu0  ;;  %v204_v41 = vadd.f32 %v203_v58, %v81_v60 }
 0x120   :  { %2807 = vst [vmem:[#allocation26_spill] sm:$0xff] %v2377_v9  ;;  %2808 = vst [vmem:[#allocation27_spill] sm:$0xff] %v2379_v0  ;;  %v2387_v1 = vadd.f32 %v308_v51, %v2316_v53  ;;  %v310_v7 = vpop.f32.mrb[15].mxu1  ;;  %v2389_v29 = vadd.f32 %v237_v62, %v81_v60  ;;  %v275_v0 = vadd.f32 %v2320_v55, %v2316_v53 }
 0x121   :  { %2809 = vst [vmem:[#allocation28_spill] sm:$0xff] %v2382_v49  ;;  %2810 = vst [vmem:[#allocation29_spill] sm:$0xff] %v2384_v3  ;;  %v2392_v6 = vadd.f32 %v310_v7, %v2322_v56  ;;  %v277_v49 = vadd.f32 %v276_v59, %v2322_v56 }
 0x122   :  { %2811 = vst [vmem:[#allocation30_spill] sm:$0xff] %v2387_v1  ;;  %2812 = vst [vmem:[#allocation31_spill] sm:$0xff] %v2389_v29 }
 0x123   :  { %2813 = vst [vmem:[#allocation32_spill] sm:$0xff] %v2392_v6 }
 0x124   :  { %v579_v47 = vpop.f32.mrb[16].mxu0 }
 0x125   :  { %v620_v3 = vpop.f32.mrb[16].mxu1  ;;  %v627_v9 = vadd.f32 %v579_v47, %v202_v52  ;;  %v581_v51 = vpop.f32.mrb[17].mxu0  ;;  %v2814_v52 = vmov 0  }
 0x126   :  { %v629_v61 = vadd.f32 %v620_v3, %v275_v0  ;;  %v622_v1 = vpop.f32.mrb[17].mxu1  ;;  %v628_v50 = vadd.f32 %v581_v51, %v204_v41  ;;  %v583_v29 = vpop.f32.mrb[18].mxu0 }
 0x127   :  { %v630_v62 = vadd.f32 %v622_v1, %v277_v49  ;;  %v624_v48 = vpop.f32.mrb[18].mxu1  ;;  %v1664_v7 = vmul.f32 -1.442695, %v627_v9  ;;  %v584_v6 = vpop.f32.mrb[19].mxu0 }
 0x128   :  { %v625_v46 = vpop.f32.mrb[19].mxu1  ;;  %v1665_v54 = vmul.f32 -1.442695, %v628_v50  ;;  %v2401_v50 = vpop.permute.xlu0 %347 }
 0x129   :  { %1815 = vpow2.f32 %v1664_v7  ;;  %v1666_v53 = vmul.f32 -1.442695, %v630_v62  ;;  %vm655_vm1 = vcmp.gt.s32.totalorder %v2401_v50, 0  ;;  %vm773_vm3 = vcmp.gt.s32.totalorder %v2401_v50, 1 }
 0x12a   :  { %1817 = vpow2.f32 %v1665_v54  ;;  %vm1667_vm2 = vmpackc.low %vm655_vm1, %vm655_vm1  ;;  %vm891_vm4 = vcmp.gt.s32.totalorder %v2401_v50, 2  ;;  %vm1009_vm5 = vcmp.gt.s32.totalorder %v2401_v50, 3  ;;  %vm1127_vm6 = vcmp.gt.s32.totalorder %v2401_v50, 4 }
 0x12b   :  { %1819 = vpow2.f32 %v1666_v53  ;;  %vm1245_vm7 = vcmp.gt.s32.totalorder %v2401_v50, 5  ;;  %vm1363_vm8 = vcmp.gt.s32.totalorder %v2401_v50, 6  ;;  %vm1481_vm10 = vcmp.gt.s32.totalorder %v2401_v50, 7 }
 0x12c   :  { %1821 = vtanh.f32 %v629_v61 }
 0x133   :  { %v1816_v55 = vpop.eup %1815 }
 0x134   :  { %v1818_v57 = vpop.eup %1817  ;;  %v634_v56 = vadd.f32 1.0, %v1816_v55 }
 0x135   :  { %v640_v58 = vadd.f32 1.0, %v1818_v57  ;;  %v1820_v0 = vpop.eup %1819 }
 0x136   :  { %1823 = vrcp.f32 %v634_v56  ;;  %v1822_v59 = vpop.eup %1821  ;;  %v647_v29 = vadd.f32 1.0, %v1820_v0 }
 0x137   :  { %1825 = vrcp.f32 %v640_v58 }
 0x138   :  { %1827 = vrcp.f32 %v647_v29 }
 0x140   :  { %v1824_v60 = vpop.eup %1823 }
 0x141   :  { %v1826_v3 = vpop.eup %1825  ;;  %v651_v48 = vmul.f32 %v1824_v60, %v1822_v59 }
 0x142   :  { %v650_v1 = vmul.f32 0.0, %v1826_v3  ;;  %v1828_v9 = vpop.eup %1827 }
 0x144   :  { %v2398_v46 = vadd.f32 %v651_v48, %v650_v1 }
 0x146   :  { %1829 = vtanh.f32 %v2398_v46 }
 0x150   :  { %v1830_v49 = vpop.eup %1829 }
 0x151   :  { %v2403_v61 = vmul.f32 %v1830_v49, %v1828_v9  ;;  %v657_v49 = vsel %vm655_vm1, %v2398_v46, 0.0 }
 0x153   :  { %v1668_v6 = vpack.c.bf16 %v2403_v61, %v2403_v61 }
 0x155   :  { %1669 = vmatmul.mubr.msk.bf16.vlgmr.msra.gmra.mrb[20].mxu0 %vm1667_vm2, %v1668_v6  ;;  %1672 = vmatmul.mubr.msk.bf16.vlgmr.msra.gmra.mrb[20].mxu1 %vm1667_vm2, %v1668_v6 }
 0x156   :  { %782 = vmatpush1.bf16.msra.mxu0 %v2155_v12  ;;  %823 = vmatpush1.bf16.msra.mxu1 %v2157_v13 }
 0x157   :  { %783 = vmatprep.subr.bf16.mxu0 %v2160_v14  ;;  %824 = vmatprep.subr.bf16.mxu1 %v2163_v15 }
 0x158   :  { %813 = vmatprep.mubr.bf16.mxu0 %v2814_v52  ;;  %854 = vmatprep.mubr.bf16.mxu1 %v2814_v52 }
 0x15a   :  { %784 = vmatpush1.bf16.msra.mxu0 %v2167_v16  ;;  %825 = vmatpush1.bf16.msra.mxu1 %v2171_v17 }
 0x15b   :  { %785 = vmatprep.subr.bf16.mxu0 %v2175_v18  ;;  %826 = vmatprep.subr.bf16.mxu1 %v2182_v20 }
 0x15e   :  { %786 = vmatpush1.bf16.msra.mxu0 %v2184_v21  ;;  %827 = vmatpush1.bf16.msra.mxu1 %v2188_v22 }
 0x15f   :  { %787 = vmatprep.subr.bf16.mxu0 %v2192_v23  ;;  %828 = vmatprep.subr.bf16.mxu1 %v2194_v24 }
 0x162   :  { %788 = vmatpush1.bf16.msra.mxu0 %v2198_v25  ;;  %829 = vmatpush1.bf16.msra.mxu1 %v2202_v26 }
 0x163   :  { %789 = vmatprep.subr.bf16.mxu0 %v2206_v27  ;;  %830 = vmatprep.subr.bf16.mxu1 %v2208_v28 }
 0x166   :  { %790 = vmatpush1.bf16.msra.mxu0 %v2215_v30  ;;  %831 = vmatpush1.bf16.msra.mxu1 %v2217_v31 }
 0x167   :  { %791 = vmatprep.subr.bf16.mxu0 %v2221_v32  ;;  %832 = vmatprep.subr.bf16.mxu1 %v2225_v33 }
 0x16a   :  { %792 = vmatpush1.bf16.msra.mxu0 %v2229_v34  ;;  %833 = vmatpush1.bf16.msra.mxu1 %v2231_v35 }
 0x16b   :  { %793 = vmatprep.subr.bf16.mxu0 %v2235_v36  ;;  %834 = vmatprep.subr.bf16.mxu1 %v2242_v38 }
 0x16e   :  { %794 = vmatpush1.bf16.msra.mxu0 %v2246_v39  ;;  %835 = vmatpush1.bf16.msra.mxu1 %v2248_v40 }
 0x16f   :  { %795 = vmatprep.subr.bf16.mxu0 %v2253_v42  ;;  %836 = vmatprep.subr.bf16.mxu1 %v2255_v43 }
 0x172   :  { %796 = vmatpush1.bf16.msra.mxu0 %v2261_v44  ;;  %837 = vmatpush1.bf16.msra.mxu1 %v2267_v45 }
 0x173   :  { %899 = vmatprep.subr.bf16.mxu0 %v2151_v10  ;;  %940 = vmatprep.subr.bf16.mxu1 %v2153_v11 }
 0x228   :  { %v697_v41 = vpop.f32.mrb[20].mxu0  ;;  %v738_v47 = vpop.f32.mrb[20].mxu1 }
 0x229   :  { %v745_v51 = vadd.f32 %v697_v41, %v2324_v63  ;;  %v747_v62 = vadd.f32 %v738_v47, %v2327_v2  ;;  %v699_v7 = vpop.f32.mrb[21].mxu0  ;;  %v740_v54 = vpop.f32.mrb[21].mxu1 }
 0x22a   :  { %v746_v53 = vadd.f32 %v699_v7, %v2329_v4  ;;  %v748_v55 = vadd.f32 %v740_v54, %v2332_v5  ;;  %v701_v57 = vpop.f32.mrb[22].mxu0  ;;  %v742_v56 = vpop.f32.mrb[22].mxu1 }
 0x22b   :  { %v1673_v58 = vmul.f32 -1.442695, %v745_v51  ;;  %v702_v0 = vpop.f32.mrb[23].mxu0  ;;  %v743_v59 = vpop.f32.mrb[23].mxu1 }
 0x22c   :  { %v1674_v60 = vmul.f32 -1.442695, %v746_v53  ;;  %v1675_v3 = vmul.f32 -1.442695, %v748_v55  ;;  %v656_v55 = vsel %vm655_vm1, %v2403_v61, 0.0 }
 0x22d   :  { %1831 = vpow2.f32 %v1673_v58 }
 0x22e   :  { %1833 = vpow2.f32 %v1674_v60 }
 0x22f   :  { %1835 = vpow2.f32 %v1675_v3 }
 0x230   :  { %1837 = vtanh.f32 %v747_v62 }
 0x237   :  { %v1832_v48 = vpop.eup %1831 }
 0x238   :  { %v1834_v29 = vpop.eup %1833  ;;  %v752_v63 = vadd.f32 1.0, %v1832_v48  ;;  %v2815_v48 = vld [vmem:[#allocation12_spill] sm:$0xff] }
 0x239   :  { %v758_v2 = vadd.f32 1.0, %v1834_v29  ;;  %v1836_v4 = vpop.eup %1835 }
 0x23a   :  { %1839 = vrcp.f32 %v752_v63  ;;  %v1838_v1 = vpop.eup %1837  ;;  %v765_v41 = vadd.f32 1.0, %v1836_v4 }
 0x23b   :  { %1841 = vrcp.f32 %v758_v2 }
 0x23c   :  { %1843 = vrcp.f32 %v765_v41 }
 0x244   :  { %v1840_v5 = vpop.eup %1839 }
 0x245   :  { %v1842_v9 = vpop.eup %1841  ;;  %v769_v6 = vmul.f32 %v1840_v5, %v1838_v1 }
 0x246   :  { %v768_v47 = vmul.f32 %v1842_v9, %v657_v49  ;;  %v1844_v7 = vpop.eup %1843 }
 0x248   :  { %v770_v51 = vadd.f32 %v769_v6, %v768_v47 }
 0x24a   :  { %1845 = vtanh.f32 %v770_v51  ;;  %v2453_v62 = vsel %vm773_vm3, %v770_v51, %v657_v49 }
 0x254   :  { %v1846_v54 = vpop.eup %1845 }
 0x255   :  { %v772_v53 = vmul.f32 %v1846_v54, %v1844_v7 }
 0x257   :  { %v2458_v57 = vsel %vm773_vm3, %v772_v53, %v656_v55 }
 0x258   :  { %v780_v46 = vpack.c.bf16 %v2458_v57, %v2458_v57 }
 0x25a   :  { %814 = vmatmul.mubr.bf16.vlgmr.msra.gmra.mrb[24].mxu0 %v780_v46  ;;  %855 = vmatmul.mubr.bf16.vlgmr.msra.gmra.mrb[24].mxu1 %v780_v46 }
 0x25b   :  { %900 = vmatpush1.bf16.msra.mxu0 %v2155_v12  ;;  %941 = vmatpush1.bf16.msra.mxu1 %v2157_v13 }
 0x25c   :  { %901 = vmatprep.subr.bf16.mxu0 %v2160_v14  ;;  %942 = vmatprep.subr.bf16.mxu1 %v2163_v15 }
 0x25d   :  { %931 = vmatprep.mubr.bf16.mxu0 %v2814_v52  ;;  %972 = vmatprep.mubr.bf16.mxu1 %v2814_v52 }
 0x25f   :  { %902 = vmatpush1.bf16.msra.mxu0 %v2167_v16  ;;  %943 = vmatpush1.bf16.msra.mxu1 %v2171_v17 }
 0x260   :  { %903 = vmatprep.subr.bf16.mxu0 %v2175_v18  ;;  %944 = vmatprep.subr.bf16.mxu1 %v2182_v20 }
 0x263   :  { %904 = vmatpush1.bf16.msra.mxu0 %v2184_v21  ;;  %945 = vmatpush1.bf16.msra.mxu1 %v2188_v22 }
 0x264   :  { %905 = vmatprep.subr.bf16.mxu0 %v2192_v23  ;;  %946 = vmatprep.subr.bf16.mxu1 %v2194_v24 }
 0x267   :  { %906 = vmatpush1.bf16.msra.mxu0 %v2198_v25  ;;  %947 = vmatpush1.bf16.msra.mxu1 %v2202_v26 }
 0x268   :  { %907 = vmatprep.subr.bf16.mxu0 %v2206_v27  ;;  %948 = vmatprep.subr.bf16.mxu1 %v2208_v28 }
 0x26b   :  { %908 = vmatpush1.bf16.msra.mxu0 %v2215_v30  ;;  %949 = vmatpush1.bf16.msra.mxu1 %v2217_v31 }
 0x26c   :  { %909 = vmatprep.subr.bf16.mxu0 %v2221_v32  ;;  %950 = vmatprep.subr.bf16.mxu1 %v2225_v33 }
 0x26f   :  { %910 = vmatpush1.bf16.msra.mxu0 %v2229_v34  ;;  %951 = vmatpush1.bf16.msra.mxu1 %v2231_v35 }
 0x270   :  { %911 = vmatprep.subr.bf16.mxu0 %v2235_v36  ;;  %952 = vmatprep.subr.bf16.mxu1 %v2242_v38 }
 0x273   :  { %912 = vmatpush1.bf16.msra.mxu0 %v2246_v39  ;;  %953 = vmatpush1.bf16.msra.mxu1 %v2248_v40 }
 0x274   :  { %913 = vmatprep.subr.bf16.mxu0 %v2253_v42  ;;  %954 = vmatprep.subr.bf16.mxu1 %v2255_v43 }
 0x277   :  { %914 = vmatpush1.bf16.msra.mxu0 %v2261_v44  ;;  %955 = vmatpush1.bf16.msra.mxu1 %v2267_v45 }
 0x278   :  { %1017 = vmatprep.subr.bf16.mxu0 %v2151_v10  ;;  %1058 = vmatprep.subr.bf16.mxu1 %v2153_v11 }
 0x32d   :  { %v815_v61 = vpop.f32.mrb[24].mxu0  ;;  %v856_v56 = vpop.f32.mrb[24].mxu1 }
 0x32e   :  { %v863_v58 = vadd.f32 %v815_v61, %v2334_v8  ;;  %v865_v0 = vadd.f32 %v856_v56, %v2337_v19  ;;  %v817_v59 = vpop.f32.mrb[25].mxu0  ;;  %v858_v60 = vpop.f32.mrb[25].mxu1 }
 0x32f   :  { %v864_v3 = vadd.f32 %v817_v59, %v2339_v37  ;;  %v866_v29 = vadd.f32 %v858_v60, %v2815_v48  ;;  %v819_v63 = vpop.f32.mrb[26].mxu0  ;;  %v860_v2 = vpop.f32.mrb[26].mxu1  ;;  %v2819_v48 = vld [vmem:[#allocation16_spill] sm:$0xff] }
 0x330   :  { %v1676_v4 = vmul.f32 -1.442695, %v863_v58  ;;  %v820_v1 = vpop.f32.mrb[27].mxu0  ;;  %v861_v5 = vpop.f32.mrb[27].mxu1 }
 0x331   :  { %v1677_v9 = vmul.f32 -1.442695, %v864_v3  ;;  %v1678_v49 = vmul.f32 -1.442695, %v866_v29 }
 0x332   :  { %1847 = vpow2.f32 %v1676_v4 }
 0x333   :  { %1849 = vpow2.f32 %v1677_v9 }
 0x334   :  { %1851 = vpow2.f32 %v1678_v49 }
 0x335   :  { %1853 = vtanh.f32 %v865_v0 }
 0x33c   :  { %v1848_v6 = vpop.eup %1847 }
 0x33d   :  { %v1850_v41 = vpop.eup %1849  ;;  %v870_v8 = vadd.f32 1.0, %v1848_v6 }
 0x33e   :  { %v876_v19 = vadd.f32 1.0, %v1850_v41  ;;  %v1852_v37 = vpop.eup %1851 }
 0x33f   :  { %1855 = vrcp.f32 %v870_v8  ;;  %v1854_v47 = vpop.eup %1853  ;;  %v883_v53 = vadd.f32 1.0, %v1852_v37 }
 0x340   :  { %1857 = vrcp.f32 %v876_v19 }
 0x341   :  { %1859 = vrcp.f32 %v883_v53 }
 0x349   :  { %v1856_v51 = vpop.eup %1855 }
 0x34a   :  { %v1858_v7 = vpop.eup %1857  ;;  %v887_v54 = vmul.f32 %v1856_v51, %v1854_v47 }
 0x34b   :  { %v886_v55 = vmul.f32 %v1858_v7, %v2453_v62  ;;  %v1860_v56 = vpop.eup %1859 }
 0x34d   :  { %v888_v46 = vadd.f32 %v887_v54, %v886_v55 }
 0x34f   :  { %1861 = vtanh.f32 %v888_v46  ;;  %v2503_v61 = vsel %vm891_vm4, %v888_v46, %v2453_v62 }
 0x359   :  { %v1862_v58 = vpop.eup %1861 }
 0x35a   :  { %v890_v0 = vmul.f32 %v1862_v58, %v1860_v56 }
 0x35c   :  { %v2506_v59 = vsel %vm891_vm4, %v890_v0, %v2458_v57  ;;  %v2818_v57 = vld [vmem:[#allocation15_spill] sm:$0xff] }
 0x35d   :  { %v898_v60 = vpack.c.bf16 %v2506_v59, %v2506_v59 }
 0x35f   :  { %932 = vmatmul.mubr.bf16.vlgmr.msra.gmra.mrb[28].mxu0 %v898_v60  ;;  %973 = vmatmul.mubr.bf16.vlgmr.msra.gmra.mrb[28].mxu1 %v898_v60 }
 0x360   :  { %1018 = vmatpush1.bf16.msra.mxu0 %v2155_v12  ;;  %1059 = vmatpush1.bf16.msra.mxu1 %v2157_v13 }
 0x361   :  { %1019 = vmatprep.subr.bf16.mxu0 %v2160_v14  ;;  %1060 = vmatprep.subr.bf16.mxu1 %v2163_v15  ;;  %v2816_v14 = vld [vmem:[#allocation13_spill] sm:$0xff] }
 0x362   :  { %1049 = vmatprep.mubr.bf16.mxu0 %v2814_v52  ;;  %1090 = vmatprep.mubr.bf16.mxu1 %v2814_v52 }
 0x364   :  { %1020 = vmatpush1.bf16.msra.mxu0 %v2167_v16  ;;  %1061 = vmatpush1.bf16.msra.mxu1 %v2171_v17  ;;  %v2817_v16 = vld [vmem:[#allocation14_spill] sm:$0xff] }
 0x365   :  { %1021 = vmatprep.subr.bf16.mxu0 %v2175_v18  ;;  %1062 = vmatprep.subr.bf16.mxu1 %v2182_v20 }
 0x368   :  { %1022 = vmatpush1.bf16.msra.mxu0 %v2184_v21  ;;  %1063 = vmatpush1.bf16.msra.mxu1 %v2188_v22 }
 0x369   :  { %1023 = vmatprep.subr.bf16.mxu0 %v2192_v23  ;;  %1064 = vmatprep.subr.bf16.mxu1 %v2194_v24 }
 0x36c   :  { %1024 = vmatpush1.bf16.msra.mxu0 %v2198_v25  ;;  %1065 = vmatpush1.bf16.msra.mxu1 %v2202_v26 }
 0x36d   :  { %1025 = vmatprep.subr.bf16.mxu0 %v2206_v27  ;;  %1066 = vmatprep.subr.bf16.mxu1 %v2208_v28 }
 0x370   :  { %1026 = vmatpush1.bf16.msra.mxu0 %v2215_v30  ;;  %1067 = vmatpush1.bf16.msra.mxu1 %v2217_v31 }
 0x371   :  { %1027 = vmatprep.subr.bf16.mxu0 %v2221_v32  ;;  %1068 = vmatprep.subr.bf16.mxu1 %v2225_v33 }
 0x374   :  { %1028 = vmatpush1.bf16.msra.mxu0 %v2229_v34  ;;  %1069 = vmatpush1.bf16.msra.mxu1 %v2231_v35 }
 0x375   :  { %1029 = vmatprep.subr.bf16.mxu0 %v2235_v36  ;;  %1070 = vmatprep.subr.bf16.mxu1 %v2242_v38 }
 0x378   :  { %1030 = vmatpush1.bf16.msra.mxu0 %v2246_v39  ;;  %1071 = vmatpush1.bf16.msra.mxu1 %v2248_v40 }
 0x379   :  { %1031 = vmatprep.subr.bf16.mxu0 %v2253_v42  ;;  %1072 = vmatprep.subr.bf16.mxu1 %v2255_v43 }
 0x37c   :  { %1032 = vmatpush1.bf16.msra.mxu0 %v2261_v44  ;;  %1073 = vmatpush1.bf16.msra.mxu1 %v2267_v45 }
 0x37d   :  { %1135 = vmatprep.subr.bf16.mxu0 %v2151_v10  ;;  %1176 = vmatprep.subr.bf16.mxu1 %v2153_v11 }
 0x432   :  { %v933_v12 = vpop.f32.mrb[28].mxu0  ;;  %v974_v13 = vpop.f32.mrb[28].mxu1 }
 0x433   :  { %v981_v15 = vadd.f32 %v933_v12, %v2816_v14  ;;  %v983_v17 = vadd.f32 %v974_v13, %v2817_v16  ;;  %v935_v18 = vpop.f32.mrb[29].mxu0  ;;  %v976_v62 = vpop.f32.mrb[29].mxu1  ;;  %v2558_v12 = vld [vmem:[#allocation3] ss:$16 sps:$4 sm:$0xff]   ;;  %v2561_v13 = vld [vmem:[#allocation3 + $0x8] ss:$16 sps:$4 sm:$0xff]  }
 0x434   :  { %v982_v3 = vadd.f32 %v935_v18, %v2818_v57  ;;  %v984_v29 = vadd.f32 %v976_v62, %v2819_v48  ;;  %v937_v63 = vpop.f32.mrb[30].mxu0  ;;  %v978_v2 = vpop.f32.mrb[30].mxu1  ;;  %v2567_v14 = vld [vmem:[#allocation3 + $0x2c] ss:$16 sps:$4 sm:$0xff]   ;;  %v2578_v16 = vld [vmem:[#allocation3 + $0x44] ss:$16 sps:$4 sm:$0xff]  }
 0x435   :  { %v1679_v4 = vmul.f32 -1.442695, %v981_v15  ;;  %v938_v1 = vpop.f32.mrb[31].mxu0  ;;  %v979_v5 = vpop.f32.mrb[31].mxu1  ;;  %v2575_v15 = vld [vmem:[#allocation3 + $0x28] ss:$16 sps:$4 sm:$0xff]  }
 0x436   :  { %v1680_v10 = vmul.f32 -1.442695, %v982_v3  ;;  %v1681_v11 = vmul.f32 -1.442695, %v984_v29 }
 0x437   :  { %1863 = vpow2.f32 %v1679_v4 }
 0x438   :  { %1865 = vpow2.f32 %v1680_v10 }
 0x439   :  { %1867 = vpow2.f32 %v1681_v11 }
 0x43a   :  { %1869 = vtanh.f32 %v983_v17 }
 0x441   :  { %v1864_v9 = vpop.eup %1863 }
 0x442   :  { %v1866_v49 = vpop.eup %1865  ;;  %v988_v6 = vadd.f32 1.0, %v1864_v9 }
 0x443   :  { %v994_v41 = vadd.f32 1.0, %v1866_v49  ;;  %v1868_v8 = vpop.eup %1867 }
 0x444   :  { %1871 = vrcp.f32 %v988_v6  ;;  %v1870_v19 = vpop.eup %1869  ;;  %v1001_v7 = vadd.f32 1.0, %v1868_v8  ;;  %v2636_v8 = vld [vmem:[#allocation3 + $0x40] ss:$16 sps:$4 sm:$0xff]  }
 0x445   :  { %1873 = vrcp.f32 %v994_v41  ;;  %v2633_v41 = vld [vmem:[#allocation3 + $0x4c] ss:$16 sps:$4 sm:$0xff]  }
 0x446   :  { %1875 = vrcp.f32 %v1001_v7  ;;  %v2651_v7 = vld [vmem:[#allocation3 + $0x68] ss:$16 sps:$4 sm:$0xff]  }
 0x44e   :  { %v1872_v37 = vpop.eup %1871 }
 0x44f   :  { %v1874_v47 = vpop.eup %1873  ;;  %v1005_v51 = vmul.f32 %v1872_v37, %v1870_v19  ;;  %v2639_v19 = vld [vmem:[#allocation3 + $0x48] ss:$16 sps:$4 sm:$0xff]   ;;  %v2642_v37 = vld [vmem:[#allocation3 + $0x64] ss:$16 sps:$4 sm:$0xff]  }
 0x450   :  { %v1004_v54 = vmul.f32 %v1874_v47, %v2503_v61  ;;  %v1876_v46 = vpop.eup %1875  ;;  %v2645_v47 = vld [vmem:[#allocation3 + $0x6c] ss:$16 sps:$4 sm:$0xff]  }
 0x452   :  { %v1006_v53 = vadd.f32 %v1005_v51, %v1004_v54  ;;  %v2648_v51 = vld [vmem:[#allocation3 + $0x60] ss:$16 sps:$4 sm:$0xff]   ;;  %v2654_v54 = vld [vmem:[#allocation3 + $0x84] ss:$16 sps:$4 sm:$0xff]  }
 0x454   :  { %1877 = vtanh.f32 %v1006_v53  ;;  %v2551_v55 = vsel %vm1009_vm5, %v1006_v53, %v2503_v61  ;;  %v2564_v61 = vld [vmem:[#allocation3 + $0x24] ss:$16 sps:$4 sm:$0xff]   ;;  %v2657_v53 = vld [vmem:[#allocation3 + $0x8c] ss:$16 sps:$4 sm:$0xff]  }
 0x45e   :  { %v1878_v56 = vpop.eup %1877 }
 0x45f   :  { %v1008_v58 = vmul.f32 %v1878_v56, %v1876_v46  ;;  %v2663_v46 = vld [vmem:[#allocation3 + $0x88] ss:$16 sps:$4 sm:$0xff]   ;;  %v2666_v56 = vld [vmem:[#allocation3 + $0xa4] ss:$16 sps:$4 sm:$0xff]  }
 0x461   :  { %v2554_v0 = vsel %vm1009_vm5, %v1008_v58, %v2506_v59  ;;  %v2572_v59 = vld [vmem:[#allocation3 + $0x20] ss:$16 sps:$4 sm:$0xff]   ;;  %v2669_v58 = vld [vmem:[#allocation3 + $0xac] ss:$16 sps:$4 sm:$0xff]  }
 0x462   :  { %v1016_v60 = vpack.c.bf16 %v2554_v0, %v2554_v0 }
 0x464   :  { %1050 = vmatmul.mubr.bf16.vlgmr.msra.gmra.mrb[32].mxu0 %v1016_v60  ;;  %1091 = vmatmul.mubr.bf16.vlgmr.msra.gmra.mrb[32].mxu1 %v1016_v60  ;;  %v2675_v60 = vld [vmem:[#allocation3 + $0xa8] ss:$16 sps:$4 sm:$0xff]  }
 0x465   :  { %1136 = vmatpush1.bf16.msra.mxu0 %v2558_v12  ;;  %1177 = vmatpush1.bf16.msra.mxu1 %v2561_v13 }
 0x466   :  { %1137 = vmatprep.subr.bf16.mxu0 %v2564_v61  ;;  %1178 = vmatprep.subr.bf16.mxu1 %v2567_v14 }
 0x467   :  { %1167 = vmatprep.mubr.bf16.mxu0 %v2814_v52  ;;  %1208 = vmatprep.mubr.bf16.mxu1 %v2814_v52 }
 0x469   :  { %1138 = vmatpush1.bf16.msra.mxu0 %v2572_v59  ;;  %1179 = vmatpush1.bf16.msra.mxu1 %v2575_v15 }
 0x46a   :  { %1139 = vmatprep.subr.bf16.mxu0 %v2578_v16  ;;  %1180 = vmatprep.subr.bf16.mxu1 %v2182_v20  ;;  %v2604_v20 = vld [vmem:[#allocation3 + $0x4] ss:$16 sps:$4 sm:$0xff]  }
 0x46d   :  { %1140 = vmatpush1.bf16.msra.mxu0 %v2184_v21  ;;  %1181 = vmatpush1.bf16.msra.mxu1 %v2188_v22  ;;  %v2607_v21 = vld [vmem:[#allocation3 + $0xc] ss:$16 sps:$4 sm:$0xff]  }
 0x46e   :  { %1141 = vmatprep.subr.bf16.mxu0 %v2192_v23  ;;  %1182 = vmatprep.subr.bf16.mxu1 %v2194_v24  ;;  %v2820_v24 = vld [vmem:[#allocation17_spill] sm:$0xff] }
 0x471   :  { %1142 = vmatpush1.bf16.msra.mxu0 %v2198_v25  ;;  %1183 = vmatpush1.bf16.msra.mxu1 %v2202_v26  ;;  %v2821_v26 = vld [vmem:[#allocation18_spill] sm:$0xff] }
 0x472   :  { %1143 = vmatprep.subr.bf16.mxu0 %v2206_v27  ;;  %1184 = vmatprep.subr.bf16.mxu1 %v2208_v28 }
 0x475   :  { %1144 = vmatpush1.bf16.msra.mxu0 %v2215_v30  ;;  %1185 = vmatpush1.bf16.msra.mxu1 %v2217_v31  ;;  %v2822_v31 = vld [vmem:[#allocation19_spill] sm:$0xff] }
 0x476   :  { %1145 = vmatprep.subr.bf16.mxu0 %v2221_v32  ;;  %1186 = vmatprep.subr.bf16.mxu1 %v2225_v33  ;;  %v2823_v33 = vld [vmem:[#allocation20_spill] sm:$0xff] }
 0x479   :  { %1146 = vmatpush1.bf16.msra.mxu0 %v2229_v34  ;;  %1187 = vmatpush1.bf16.msra.mxu1 %v2231_v35 }
 0x47a   :  { %1147 = vmatprep.subr.bf16.mxu0 %v2235_v36  ;;  %1188 = vmatprep.subr.bf16.mxu1 %v2242_v38 }
 0x47d   :  { %1148 = vmatpush1.bf16.msra.mxu0 %v2246_v39  ;;  %1189 = vmatpush1.bf16.msra.mxu1 %v2248_v40 }
 0x47e   :  { %1149 = vmatprep.subr.bf16.mxu0 %v2253_v42  ;;  %1190 = vmatprep.subr.bf16.mxu1 %v2255_v43 }
 0x481   :  { %1150 = vmatpush1.bf16.msra.mxu0 %v2261_v44  ;;  %1191 = vmatpush1.bf16.msra.mxu1 %v2267_v45 }
 0x482   :  { %1253 = vmatprep.subr.bf16.mxu0 %v2604_v20  ;;  %1294 = vmatprep.subr.bf16.mxu1 %v2607_v21 }
 0x537   :  { %v1051_v22 = vpop.f32.mrb[32].mxu0  ;;  %v1092_v23 = vpop.f32.mrb[32].mxu1 }
 0x538   :  { %v1099_v25 = vadd.f32 %v1051_v22, %v2820_v24  ;;  %v1101_v27 = vadd.f32 %v1092_v23, %v2821_v26  ;;  %v1053_v28 = vpop.f32.mrb[33].mxu0  ;;  %v1094_v30 = vpop.f32.mrb[33].mxu1  ;;  %v2678_v22 = vld [vmem:[#allocation3 + $0xc4] ss:$16 sps:$4 sm:$0xff]   ;;  %v2681_v23 = vld [vmem:[#allocation3 + $0xcc] ss:$16 sps:$4 sm:$0xff]  }
 0x539   :  { %v1100_v32 = vadd.f32 %v1053_v28, %v2822_v31  ;;  %v1102_v34 = vadd.f32 %v1094_v30, %v2823_v33  ;;  %v1055_v35 = vpop.f32.mrb[34].mxu0  ;;  %v1096_v36 = vpop.f32.mrb[34].mxu1  ;;  %v2684_v24 = vld [vmem:[#allocation3 + $0xc0] ss:$16 sps:$4 sm:$0xff]   ;;  %v2690_v26 = vld [vmem:[#allocation3 + $0xe4] ss:$16 sps:$4 sm:$0xff]  }
 0x53a   :  { %v1682_v38 = vmul.f32 -1.442695, %v1099_v25  ;;  %v1056_v39 = vpop.f32.mrb[35].mxu0  ;;  %v1097_v40 = vpop.f32.mrb[35].mxu1  ;;  %v2687_v25 = vld [vmem:[#allocation3 + $0xc8] ss:$16 sps:$4 sm:$0xff]  }
 0x53b   :  { %v1683_v42 = vmul.f32 -1.442695, %v1100_v32  ;;  %v1684_v43 = vmul.f32 -1.442695, %v1102_v34  ;;  %v2696_v28 = vld [vmem:[#allocation3 + $0xe0] ss:$16 sps:$4 sm:$0xff]  }
 0x53c   :  { %1879 = vpow2.f32 %v1682_v38  ;;  %v2824_v32 = vld [vmem:[#allocation21_spill] sm:$0xff]  ;;  %v2825_v34 = vld [vmem:[#allocation22_spill] sm:$0xff]  ;;  %v2826_v39 = vld [vmem:[#allocation23_spill] sm:$0xff] }
 0x53d   :  { %1881 = vpow2.f32 %v1683_v42  ;;  %v2827_v42 = vld [vmem:[#allocation24_spill] sm:$0xff] }
 0x53e   :  { %1883 = vpow2.f32 %v1684_v43 }
 0x53f   :  { %1885 = vtanh.f32 %v1101_v27  ;;  %v2693_v27 = vld [vmem:[#allocation3 + $0xec] ss:$16 sps:$4 sm:$0xff]  }
 0x546   :  { %v1880_v44 = vpop.eup %1879 }
 0x547   :  { %v1882_v17 = vpop.eup %1881  ;;  %v1106_v18 = vadd.f32 1.0, %v1880_v44 }
 0x548   :  { %v1112_v62 = vadd.f32 1.0, %v1882_v17  ;;  %v1884_v57 = vpop.eup %1883 }
 0x549   :  { %1887 = vrcp.f32 %v1106_v18  ;;  %v1886_v3 = vpop.eup %1885  ;;  %v1119_v2 = vadd.f32 1.0, %v1884_v57 }
 0x54a   :  { %1889 = vrcp.f32 %v1112_v62 }
 0x54b   :  { %1891 = vrcp.f32 %v1119_v2 }
 0x553   :  { %v1888_v48 = vpop.eup %1887 }
 0x554   :  { %v1890_v29 = vpop.eup %1889  ;;  %v1123_v63 = vmul.f32 %v1888_v48, %v1886_v3 }
 0x555   :  { %v1122_v4 = vmul.f32 %v1890_v29, %v2551_v55  ;;  %v1892_v10 = vpop.eup %1891 }
 0x557   :  { %v1124_v1 = vadd.f32 %v1123_v63, %v1122_v4 }
 0x559   :  { %1893 = vtanh.f32 %v1124_v1  ;;  %v2617_v5 = vsel %vm1127_vm6, %v1124_v1, %v2551_v55  ;;  %v2660_v55 = vld [vmem:[#allocation3 + $0x80] ss:$16 sps:$4 sm:$0xff]  }
 0x563   :  { %v1894_v11 = vpop.eup %1893 }
 0x564   :  { %v1126_v9 = vmul.f32 %v1894_v11, %v1892_v10 }
 0x566   :  { %v2620_v49 = vsel %vm1127_vm6, %v1126_v9, %v2554_v0  ;;  %v2672_v0 = vld [vmem:[#allocation3 + $0xa0] ss:$16 sps:$4 sm:$0xff]  }
 0x567   :  { %v1134_v6 = vpack.c.bf16 %v2620_v49, %v2620_v49 }
 0x569   :  { %1168 = vmatmul.mubr.bf16.vlgmr.msra.gmra.mrb[36].mxu0 %v1134_v6  ;;  %1209 = vmatmul.mubr.bf16.vlgmr.msra.gmra.mrb[36].mxu1 %v1134_v6 }
 0x56a   :  { %1254 = vmatpush1.bf16.msra.mxu0 %v2558_v12  ;;  %1295 = vmatpush1.bf16.msra.mxu1 %v2561_v13 }
 0x56b   :  { %1255 = vmatprep.subr.bf16.mxu0 %v2564_v61  ;;  %1296 = vmatprep.subr.bf16.mxu1 %v2567_v14 }
 0x56c   :  { %1285 = vmatprep.mubr.bf16.mxu0 %v2814_v52  ;;  %1326 = vmatprep.mubr.bf16.mxu1 %v2814_v52 }
 0x56e   :  { %1256 = vmatpush1.bf16.msra.mxu0 %v2572_v59  ;;  %1297 = vmatpush1.bf16.msra.mxu1 %v2575_v15 }
 0x56f   :  { %1257 = vmatprep.subr.bf16.mxu0 %v2578_v16  ;;  %1298 = vmatprep.subr.bf16.mxu1 %v2633_v41 }
 0x572   :  { %1258 = vmatpush1.bf16.msra.mxu0 %v2636_v8  ;;  %1299 = vmatpush1.bf16.msra.mxu1 %v2639_v19 }
 0x573   :  { %1259 = vmatprep.subr.bf16.mxu0 %v2642_v37  ;;  %1300 = vmatprep.subr.bf16.mxu1 %v2645_v47 }
 0x576   :  { %1260 = vmatpush1.bf16.msra.mxu0 %v2648_v51  ;;  %1301 = vmatpush1.bf16.msra.mxu1 %v2651_v7 }
 0x577   :  { %1261 = vmatprep.subr.bf16.mxu0 %v2654_v54  ;;  %1302 = vmatprep.subr.bf16.mxu1 %v2657_v53 }
 0x57a   :  { %1262 = vmatpush1.bf16.msra.mxu0 %v2660_v55  ;;  %1303 = vmatpush1.bf16.msra.mxu1 %v2663_v46 }
 0x57b   :  { %1263 = vmatprep.subr.bf16.mxu0 %v2666_v56  ;;  %1304 = vmatprep.subr.bf16.mxu1 %v2669_v58 }
 0x57e   :  { %1264 = vmatpush1.bf16.msra.mxu0 %v2672_v0  ;;  %1305 = vmatpush1.bf16.msra.mxu1 %v2675_v60 }
 0x57f   :  { %1265 = vmatprep.subr.bf16.mxu0 %v2678_v22  ;;  %1306 = vmatprep.subr.bf16.mxu1 %v2681_v23 }
 0x582   :  { %1266 = vmatpush1.bf16.msra.mxu0 %v2684_v24  ;;  %1307 = vmatpush1.bf16.msra.mxu1 %v2687_v25 }
 0x583   :  { %1267 = vmatprep.subr.bf16.mxu0 %v2690_v26  ;;  %1308 = vmatprep.subr.bf16.mxu1 %v2693_v27 }
 0x586   :  { %1268 = vmatpush1.bf16.msra.mxu0 %v2696_v28  ;;  %1309 = vmatpush1.bf16.msra.mxu1 %v2267_v45 }
 0x587   :  { %1371 = vmatprep.subr.bf16.mxu0 %v2604_v20  ;;  %1412 = vmatprep.subr.bf16.mxu1 %v2607_v21 }
 0x63c   :  { %v1169_v30 = vpop.f32.mrb[36].mxu0  ;;  %v1210_v31 = vpop.f32.mrb[36].mxu1 }
 0x63d   :  { %v1217_v33 = vadd.f32 %v1169_v30, %v2824_v32  ;;  %v1219_v35 = vadd.f32 %v1210_v31, %v2825_v34  ;;  %v1171_v36 = vpop.f32.mrb[37].mxu0  ;;  %v1212_v38 = vpop.f32.mrb[37].mxu1 }
 0x63e   :  { %v1218_v40 = vadd.f32 %v1171_v36, %v2826_v39  ;;  %v1220_v43 = vadd.f32 %v1212_v38, %v2827_v42  ;;  %v1173_v44 = vpop.f32.mrb[38].mxu0  ;;  %v1214_v17 = vpop.f32.mrb[38].mxu1 }
 0x63f   :  { %v1685_v18 = vmul.f32 -1.442695, %v1217_v33  ;;  %v1174_v45 = vpop.f32.mrb[39].mxu0  ;;  %v1215_v62 = vpop.f32.mrb[39].mxu1  ;;  %v1807_v44 = vld [vmem:[#allocation6] sm:$0xff]   ;;  %v2054_v17 = vmov 0.0  }
 0x640   :  { %v1686_v20 = vmul.f32 -1.442695, %v1218_v40  ;;  %v1687_v21 = vmul.f32 -1.442695, %v1220_v43  ;;  %v1809_v45 = vld [vmem:[#allocation6 + $0x10] sm:$0xff]   ;;  %v1810_v62 = vld [vmem:[#allocation6 + $0x18] sm:$0xff]  }
 0x641   :  { %1895 = vpow2.f32 %v1685_v18  ;;  %v1808_v18 = vld [vmem:[#allocation6 + $0x8] sm:$0xff]  }
 0x642   :  { %1897 = vpow2.f32 %v1686_v20  ;;  %v1811_v20 = vld [vmem:[#allocation6 + $0x20] sm:$0xff]  }
 0x643   :  { %1899 = vpow2.f32 %v1687_v21  ;;  %v1812_v21 = vld [vmem:[#allocation6 + $0x28] sm:$0xff]  }
 0x644   :  { %1901 = vtanh.f32 %v1219_v35 }
 0x64b   :  { %v1896_v57 = vpop.eup %1895 }
 0x64c   :  { %v1898_v3 = vpop.eup %1897  ;;  %v1224_v48 = vadd.f32 1.0, %v1896_v57  ;;  %v1813_v57 = vld [vmem:[#allocation6 + $0x30] sm:$0xff]  }
 0x64d   :  { %v1230_v29 = vadd.f32 1.0, %v1898_v3  ;;  %v1900_v63 = vpop.eup %1899  ;;  %v1814_v3 = vld [vmem:[#allocation6 + $0x38] sm:$0xff]  }
 0x64e   :  { %1903 = vrcp.f32 %v1224_v48  ;;  %v1902_v2 = vpop.eup %1901  ;;  %v1237_v11 = vadd.f32 1.0, %v1900_v63  ;;  %v2832_v63 = vld [vmem:[#allocation29_spill] sm:$0xff] }
 0x64f   :  { %1905 = vrcp.f32 %v1230_v29 }
 0x650   :  { %1907 = vrcp.f32 %v1237_v11 }
 0x658   :  { %v1904_v4 = vpop.eup %1903 }
 0x659   :  { %v1906_v1 = vpop.eup %1905  ;;  %v1241_v10 = vmul.f32 %v1904_v4, %v1902_v2  ;;  %v2833_v4 = vld [vmem:[#allocation30_spill] sm:$0xff] }
 0x65a   :  { %v1240_v9 = vmul.f32 %v1906_v1, %v2617_v5  ;;  %v1908_v31 = vpop.eup %1907 }
 0x65c   :  { %v1242_v6 = vadd.f32 %v1241_v10, %v1240_v9  ;;  %v2834_v9 = vld [vmem:[#allocation31_spill] sm:$0xff] }
 0x65e   :  { %1909 = vtanh.f32 %v1242_v6  ;;  %v2709_v30 = vsel %vm1245_vm7, %v1242_v6, %v2617_v5 }
 0x668   :  { %v1910_v32 = vpop.eup %1909 }
 0x669   :  { %v1244_v33 = vmul.f32 %v1910_v32, %v1908_v31 }
 0x66b   :  { %v2712_v34 = vsel %vm1245_vm7, %v1244_v33, %v2620_v49  ;;  %v2830_v49 = vld [vmem:[#allocation27_spill] sm:$0xff] }
 0x66c   :  { %v1252_v35 = vpack.c.bf16 %v2712_v34, %v2712_v34 }
 0x66e   :  { %1286 = vmatmul.mubr.bf16.vlgmr.msra.gmra.mrb[40].mxu0 %v1252_v35  ;;  %1327 = vmatmul.mubr.bf16.vlgmr.msra.gmra.mrb[40].mxu1 %v1252_v35 }
 0x66f   :  { %1372 = vmatpush1.bf16.msra.mxu0 %v2558_v12  ;;  %1413 = vmatpush1.bf16.msra.mxu1 %v2561_v13 }
 0x670   :  { %1373 = vmatprep.subr.bf16.mxu0 %v2564_v61  ;;  %1414 = vmatprep.subr.bf16.mxu1 %v2567_v14  ;;  %v2828_v61 = vld [vmem:[#allocation25_spill] sm:$0xff] }
 0x671   :  { %1403 = vmatprep.mubr.bf16.mxu0 %v2814_v52  ;;  %1444 = vmatprep.mubr.bf16.mxu1 %v2814_v52  ;;  %v1974_v52 = vld [vmem:[#allocation3 + $0xe8] ss:$16 sps:$4 sm:$0xff]  }
 0x673   :  { %1374 = vmatpush1.bf16.msra.mxu0 %v2572_v59  ;;  %1415 = vmatpush1.bf16.msra.mxu1 %v2575_v15  ;;  %v2829_v59 = vld [vmem:[#allocation26_spill] sm:$0xff] }
 0x674   :  { %1375 = vmatprep.subr.bf16.mxu0 %v2578_v16  ;;  %1416 = vmatprep.subr.bf16.mxu1 %v2633_v41 }
 0x677   :  { %1376 = vmatpush1.bf16.msra.mxu0 %v2636_v8  ;;  %1417 = vmatpush1.bf16.msra.mxu1 %v2639_v19  ;;  %v2831_v8 = vld [vmem:[#allocation28_spill] sm:$0xff] }
 0x678   :  { %1377 = vmatprep.subr.bf16.mxu0 %v2642_v37  ;;  %1418 = vmatprep.subr.bf16.mxu1 %v2645_v47 }
 0x67b   :  { %1378 = vmatpush1.bf16.msra.mxu0 %v2648_v51  ;;  %1419 = vmatpush1.bf16.msra.mxu1 %v2651_v7 }
 0x67c   :  { %1379 = vmatprep.subr.bf16.mxu0 %v2654_v54  ;;  %1420 = vmatprep.subr.bf16.mxu1 %v2657_v53 }
 0x67f   :  { %1380 = vmatpush1.bf16.msra.mxu0 %v2660_v55  ;;  %1421 = vmatpush1.bf16.msra.mxu1 %v2663_v46 }
 0x680   :  { %1381 = vmatprep.subr.bf16.mxu0 %v2666_v56  ;;  %1422 = vmatprep.subr.bf16.mxu1 %v2669_v58 }
 0x683   :  { %1382 = vmatpush1.bf16.msra.mxu0 %v2672_v0  ;;  %1423 = vmatpush1.bf16.msra.mxu1 %v2675_v60 }
 0x684   :  { %1383 = vmatprep.subr.bf16.mxu0 %v2678_v22  ;;  %1424 = vmatprep.subr.bf16.mxu1 %v2681_v23 }
 0x687   :  { %1384 = vmatpush1.bf16.msra.mxu0 %v2684_v24  ;;  %1425 = vmatpush1.bf16.msra.mxu1 %v2687_v25 }
 0x688   :  { %1385 = vmatprep.subr.bf16.mxu0 %v2690_v26  ;;  %1426 = vmatprep.subr.bf16.mxu1 %v2693_v27 }
 0x68b   :  { %1386 = vmatpush1.bf16.msra.mxu0 %v2696_v28  ;;  %1427 = vmatpush1.bf16.msra.mxu1 %v1974_v52 }
 0x68c   :  { %1712 = vmatprep.subr.bf16.mxu0 %v2054_v17 }
 0x741   :  { %v1287_v12 = vpop.f32.mrb[40].mxu0  ;;  %v1328_v13 = vpop.f32.mrb[40].mxu1 }
 0x742   :  { %v1335_v14 = vadd.f32 %v1287_v12, %v2828_v61  ;;  %v1337_v15 = vadd.f32 %v1328_v13, %v2829_v59  ;;  %v1289_v16 = vpop.f32.mrb[41].mxu0  ;;  %v1330_v5 = vpop.f32.mrb[41].mxu1 }
 0x743   :  { %v1336_v41 = vadd.f32 %v1289_v16, %v2830_v49  ;;  %v1338_v19 = vadd.f32 %v1330_v5, %v2831_v8  ;;  %v1291_v37 = vpop.f32.mrb[42].mxu0  ;;  %v1332_v47 = vpop.f32.mrb[42].mxu1 }
 0x744   :  { %v1688_v51 = vmul.f32 -1.442695, %v1335_v14  ;;  %v1292_v7 = vpop.f32.mrb[43].mxu0  ;;  %v1333_v54 = vpop.f32.mrb[43].mxu1 }
 0x745   :  { %v1689_v53 = vmul.f32 -1.442695, %v1336_v41  ;;  %v1690_v55 = vmul.f32 -1.442695, %v1338_v19 }
 0x746   :  { %1911 = vpow2.f32 %v1688_v51 }
 0x747   :  { %1913 = vpow2.f32 %v1689_v53 }
 0x748   :  { %1915 = vpow2.f32 %v1690_v55 }
 0x749   :  { %1917 = vtanh.f32 %v1337_v15 }
 0x750   :  { %v1912_v46 = vpop.eup %1911 }
 0x751   :  { %v1914_v56 = vpop.eup %1913  ;;  %v1342_v58 = vadd.f32 1.0, %v1912_v46  ;;  %v1694_v46 = vld [vmem:[%s2789_s6] ss:$0 sm:$0xff] }
 0x752   :  { %v1348_v0 = vadd.f32 1.0, %v1914_v56  ;;  %v1916_v60 = vpop.eup %1915 }
 0x753   :  { %1919 = vrcp.f32 %v1342_v58  ;;  %v1918_v22 = vpop.eup %1917  ;;  %v1355_v26 = vadd.f32 1.0, %v1916_v60 }
 0x754   :  { %1921 = vrcp.f32 %v1348_v0 }
 0x755   :  { %1923 = vrcp.f32 %v1355_v26 }
 0x75d   :  { %v1920_v23 = vpop.eup %1919 }
 0x75e   :  { %v1922_v24 = vpop.eup %1921  ;;  %v1359_v25 = vmul.f32 %v1920_v23, %v1918_v22 }
 0x75f   :  { %v1358_v27 = vmul.f32 %v1922_v24, %v2709_v30  ;;  %v1924_v38 = vpop.eup %1923 }
 0x761   :  { %v1360_v28 = vadd.f32 %v1359_v25, %v1358_v27 }
 0x763   :  { %1925 = vtanh.f32 %v1360_v28  ;;  %v2754_v36 = vsel %vm1363_vm8, %v1360_v28, %v2709_v30  ;;  %v2835_v30 = vld [vmem:[#allocation32_spill] sm:$0xff] }
 0x76d   :  { %v1926_v39 = vpop.eup %1925 }
 0x76e   :  { %v1362_v40 = vmul.f32 %v1926_v39, %v1924_v38 }
 0x770   :  { %v2757_v42 = vsel %vm1363_vm8, %v1362_v40, %v2712_v34 }
 0x771   :  { %v1370_v43 = vpack.c.bf16 %v2757_v42, %v2757_v42 }
 0x773   :  { %1404 = vmatmul.mubr.bf16.vlgmr.msra.gmra.mrb[44].mxu0 %v1370_v43  ;;  %1445 = vmatmul.mubr.bf16.vlgmr.msra.gmra.mrb[44].mxu1 %v1370_v43 }
 0x774   :  { %1713 = vmatpush3.bf16.msra.mxu0 %v1807_v44  ;;  %1728 = vmatprep.mubr.msk.bf16.mxu0 %vm2055_vm9, %v2054_v17 }
 0x775   :  { %1714 = vmatprep.subr.bf16.mxu0 %v2054_v17 }
 0x778   :  { %1715 = vmatpush3.bf16.msra.mxu0 %v1808_v18 }
 0x779   :  { %1716 = vmatprep.subr.bf16.mxu0 %v2054_v17 }
 0x77c   :  { %1717 = vmatpush3.bf16.msra.mxu0 %v1809_v45 }
 0x77d   :  { %1718 = vmatprep.subr.bf16.mxu0 %v2054_v17 }
 0x780   :  { %1719 = vmatpush3.bf16.msra.mxu0 %v1810_v62 }
 0x781   :  { %1720 = vmatprep.subr.bf16.mxu0 %v2054_v17 }
 0x784   :  { %1721 = vmatpush3.bf16.msra.mxu0 %v1811_v20 }
 0x785   :  { %1722 = vmatprep.subr.bf16.mxu0 %v2054_v17 }
 0x788   :  { %1723 = vmatpush3.bf16.msra.mxu0 %v1812_v21 }
 0x789   :  { %1724 = vmatprep.subr.bf16.mxu0 %v2054_v17 }
 0x78c   :  { %1725 = vmatpush3.bf16.msra.mxu0 %v1813_v57 }
 0x78d   :  { %1726 = vmatprep.subr.bf16.mxu0 %v2054_v17 }
 0x790   :  { %1727 = vmatpush3.bf16.msra.mxu0 %v1814_v3 }
 0x846   :  { %v1405_v48 = vpop.f32.mrb[44].mxu0  ;;  %v1446_v29 = vpop.f32.mrb[44].mxu1 }
 0x847   :  { %v1453_v2 = vadd.f32 %v1405_v48, %v2832_v63  ;;  %v1455_v1 = vadd.f32 %v1446_v29, %v2833_v4  ;;  %v1407_v10 = vpop.f32.mrb[45].mxu0  ;;  %v1448_v11 = vpop.f32.mrb[45].mxu1 }
 0x848   :  { %v1454_v6 = vadd.f32 %v1407_v10, %v2834_v9  ;;  %v1456_v31 = vadd.f32 %v1448_v11, %v2835_v30  ;;  %v1409_v32 = vpop.f32.mrb[46].mxu0  ;;  %v1450_v33 = vpop.f32.mrb[46].mxu1 }
 0x849   :  { %v1691_v34 = vmul.f32 -1.442695, %v1453_v2  ;;  %v1410_v35 = vpop.f32.mrb[47].mxu0  ;;  %v1451_v52 = vpop.f32.mrb[47].mxu1 }
 0x84a   :  { %v1692_v12 = vmul.f32 -1.442695, %v1454_v6  ;;  %v1693_v13 = vmul.f32 -1.442695, %v1456_v31 }
 0x84b   :  { %1927 = vpow2.f32 %v1691_v34 }
 0x84c   :  { %1929 = vpow2.f32 %v1692_v12 }
 0x84d   :  { %1931 = vpow2.f32 %v1693_v13 }
 0x84e   :  { %1933 = vtanh.f32 %v1455_v1 }
 0x855   :  { %v1928_v61 = vpop.eup %1927 }
 0x856   :  { %v1930_v14 = vpop.eup %1929  ;;  %v1460_v59 = vadd.f32 1.0, %v1928_v61 }
 0x857   :  { %v1466_v15 = vadd.f32 1.0, %v1930_v14  ;;  %v1932_v16 = vpop.eup %1931 }
 0x858   :  { %1935 = vrcp.f32 %v1460_v59  ;;  %v1934_v5 = vpop.eup %1933  ;;  %v1473_v19 = vadd.f32 1.0, %v1932_v16 }
 0x859   :  { %1937 = vrcp.f32 %v1466_v15 }
 0x85a   :  { %1939 = vrcp.f32 %v1473_v19 }
 0x862   :  { %v1936_v49 = vpop.eup %1935 }
 0x863   :  { %v1938_v41 = vpop.eup %1937  ;;  %v1477_v8 = vmul.f32 %v1936_v49, %v1934_v5 }
 0x864   :  { %v1476_v37 = vmul.f32 %v1938_v41, %v2754_v36  ;;  %v1940_v51 = vpop.eup %1939 }
 0x866   :  { %v1478_v47 = vadd.f32 %v1477_v8, %v1476_v37 }
 0x868   :  { %1941 = vtanh.f32 %v1478_v47 }
 0x872   :  { %v1942_v7 = vpop.eup %1941 }
 0x873   :  { %v1480_v54 = vmul.f32 %v1942_v7, %v1940_v51 }
 0x875   :  { %v1482_v53 = vsel %vm1481_vm10, %v1480_v54, %v2757_v42 }
 0x876   :  { %v1483_v55 = vpack.c.bf16 %v1482_v53, %v1482_v53 }
 0x878   :  { %1729 = vmatmul.mubr.bf16.vlgmr.msra.gmra.mrb[48].mxu0 %v1483_v55 }
 0x94b   :  { %v1589_v56 = vpop.f32.mrb[48].mxu0 }
 0x94c   :  { %v1590_v58 = vadd.f32 %v1694_v46, %v1589_v56  ;;  %v1730_v0 = vpop.f32.mrb[49].mxu0 }
 0x94d   :  { %v1592_v60 = vpop.f32.mrb[50].mxu0 }
 0x94e   :  { %1595 = vst [vmem:[#allocation8] sm:$0xff] %v1590_v58  ;;  %v1731_v22 = vpop.f32.mrb[51].mxu0 }
 0x94f   :  { %2030 = shalt.err (!%p2027_p6)
}
 0x950   :  { %s2031_s6 = scalar_lea.hbm %s2790_s7, 128 }
 0x951   :  { %p2032_p7 = scmp.ne.s32.totalorder %s2790_s7, %s2031_s6  ;;  %p2035_p8 = scmp.lt.u32.totalorder %s2031_s6, %s2790_s7 }
 0x953   :  { %p2037_p9 = pnand %p2035_p8, %p2032_p7 }
 0x955   :  { %2040 = shalt.err (!%p2037_p9)
}
 0x956   :  { %1605 = dma.vmem_to_hbm [thread:$0]  %s1603_s30, 128, %s2790_s7, [#allocation5]  }
 0x957   :  { %2045 = dma.done.wait [#allocation5], 128  }
 0x958   :  { %2046 = vsyncadd [#allocation5], 4294967168 }
 0x959   :  { %1609 = vsyncpa [#allocation4], 1 }
 0x95a   :  { %1610 = vsyncpa [#allocation7], 1 }
 0x95b   :  { %1611 = vsyncpa [#allocation5], 1 }

</bundles_post_ra>
